<compile_context>
chip_gen: v6e
topology: v6e:2x2x1
jax: 0.10.0
libtpu: 0.0.40
codegen_flags: <defaults>
</compile_context>

<pallas_src>
import functools

import jax
import jax.numpy as jnp
from jax.experimental import pallas as pl
from jax.experimental.pallas import tpu as pltpu


# ----------------------------------------------------------------------------
# Kernel 1 (fused): backbone linear -> projector MLP -> row L2-normalize
#   feat_v = x_v @ Wbb + bbb      (per view v in {0,1}; K-tiled, f32 VMEM acc)
#   h_v    = relu(feat_v @ W1 + b1)
#   z_v    = h_v @ W2             (W2 zero-padded to a lane-dense width)
#   out_v  = bf16( z_v * rsqrt(max(sum z_v^2, eps^2)) )     (== F.normalize)
# ----------------------------------------------------------------------------
def _encode_kernel(x1_ref, x2_ref, bbw_ref, bbb_ref, w1_ref, b1_ref, w2_ref,
                   z_ref, acc_ref):
    k = pl.program_id(1)

    @pl.when(k == 0)
    def _init():
        acc_ref[...] = jnp.zeros_like(acc_ref)

    # K-tiled backbone matmul: bf16 operands (cast after DMA), f32 accumulation.
    w = bbw_ref[...]                                          # (tk, Dfeat) bf16
    acc_ref[0] += jnp.dot(x1_ref[...].astype(jnp.bfloat16), w,
                          preferred_element_type=jnp.float32)
    acc_ref[1] += jnp.dot(x2_ref[...].astype(jnp.bfloat16), w,
                          preferred_element_type=jnp.float32)

    @pl.when(k == pl.num_programs(1) - 1)
    def _epilogue():
        bbb = bbb_ref[...]
        w1 = w1_ref[...]
        b1 = b1_ref[...]
        w2 = w2_ref[...]
        for v in range(2):                                    # unrolled, static
            feat = acc_ref[v] + bbb                           # (tm, Dfeat) f32
            h = jnp.dot(feat.astype(jnp.bfloat16), w1,
                        preferred_element_type=jnp.float32) + b1
            h = jnp.maximum(h, 0.0)                           # ReLU
            z = jnp.dot(h.astype(jnp.bfloat16), w2,
                        preferred_element_type=jnp.float32)   # (tm, Dzp) f32
            sumsq = jnp.sum(z * z, axis=1, keepdims=True)
            inv = jax.lax.rsqrt(jnp.maximum(sumsq, jnp.float32(1e-24)))
            z_ref[v] = (z * inv).astype(z_ref.dtype)          # bf16 store


def encode_forward(x1, x2, bb_w, bb_b, p_w1, p_b1, p_w2):
    """x1, x2: (B, Din) f32 -> L2-normalized projections (2, B, Dzp) bf16."""
    B, Din = x1.shape
    Dfeat = bb_w.shape[1]
    Dh = p_w1.shape[1]
    Dz = p_w2.shape[1]
    Dzp = ((Dz + 127) // 128) * 128          # lane-dense output width

    # --- K (input-feature) tiling -------------------------------------------
    if Din % 512 == 0:
        if Din % 2048 == 0:
            tk = 2048
        elif Din % 1024 == 0:
            tk = 1024
        else:
            tk = 512
    elif Din <= 2048:
        tk = Din                              # small odd Din: one K tile
    else:
        # Large odd Din: zero-pad features instead of a VMEM-busting tk=Din.
        pad = (-Din) % 512
        x1 = jnp.pad(x1, ((0, 0), (0, pad)))
        x2 = jnp.pad(x2, ((0, 0), (0, pad)))
        bb_w = jnp.pad(bb_w, ((0, pad), (0, 0)))
        Din = Din + pad
        tk = 512

    # --- M (per-view batch) tiling: biggest tile within a VMEM budget --------
    def need_bytes(tm):
        return (2 * 2 * tm * tk * 4           # x1/x2 blocks, dbl-buffered, f32
                + 2 * tk * Dfeat * 2          # backbone-weight block, dbl-buf bf16
                + 2 * tm * Dfeat * 4          # f32 accumulator scratch (2 views)
                + 2 * 2 * tm * Dzp * 2        # output block, dbl-buffered, bf16
                + 2 * (Dfeat * Dh + Dh * Dzp) * 2   # resident W1/W2 (bf16, x2)
                + 2 * (Dfeat + Dh) * 4)       # resident biases

    budget = 40 << 20                          # safe on v5e/v6e (128 MiB) & v7x (64 MiB)
    tm = B                                     # one m-tile => weight streamed once
    if need_bytes(tm) > budget:
        for t in (1024, 512, 256, 128, 64, 32, 16, 8):
            if t < B and B % t == 0 and need_bytes(t) <= budget:
                tm = t
                break

    grid = (B // tm, Din // tk)

    # Weights are parameters: casting/padding them in the wrapper is a one-time
    # tiny op (unlike x, which stays f32 and is cast inside the kernel).
    w_bb = bb_w.astype(jnp.bfloat16)
    w1 = p_w1.astype(jnp.bfloat16)
    w2 = jnp.pad(p_w2, ((0, 0), (0, Dzp - Dz))).astype(jnp.bfloat16)
    b_bb = bb_b.reshape(1, Dfeat).astype(jnp.float32)
    b1 = p_b1.reshape(1, Dh).astype(jnp.float32)

    vmem_limit = int(min(max(2 * need_bytes(tm), 32 << 20), 56 << 20))

    return pl.pallas_call(
        _encode_kernel,
        out_shape=jax.ShapeDtypeStruct((2, B, Dzp), jnp.bfloat16),
        grid=grid,
        in_specs=[
            pl.BlockSpec((tm, tk), lambda m, k: (m, k)),      # x1 (f32)
            pl.BlockSpec((tm, tk), lambda m, k: (m, k)),      # x2 (f32)
            pl.BlockSpec((tk, Dfeat), lambda m, k: (k, 0)),   # backbone weight
            pl.BlockSpec((1, Dfeat), lambda m, k: (0, 0)),    # backbone bias
            pl.BlockSpec((Dfeat, Dh), lambda m, k: (0, 0)),   # projector W1
            pl.BlockSpec((1, Dh), lambda m, k: (0, 0)),       # projector b1
            pl.BlockSpec((Dh, Dzp), lambda m, k: (0, 0)),     # projector W2 (padded)
        ],
        out_specs=pl.BlockSpec((2, tm, Dzp), lambda m, k: (0, m, 0)),
        scratch_shapes=[pltpu.VMEM((2, tm, Dfeat), jnp.float32)],
        compiler_params=pltpu.CompilerParams(
            dimension_semantics=("parallel", "arbitrary"),
            vmem_limit_bytes=vmem_limit),
    )(x1, x2, w_bb, b_bb, w1, b1, w2)


# ----------------------------------------------------------------------------
# Kernel 2: NT-Xent loss on already-normalized bf16 z (N = 2*batch_size rows)
#   loss_i = logsumexp_{j != i} (<z_i,z_j>/T)  -  <z_i, z_{(i+B) mod N}>/T
#   loss   = sum_i loss_i / N        (== CrossEntropyLoss(sum) / N of the ref)
# Row-tiled: per grid step, a (tr, N) slab of sim; full z stays resident.
# ----------------------------------------------------------------------------
def _nt_xent_kernel(z_ref, o_ref, *, batch_size, num_rows, row_tile,
                    inv_temperature):
    i = pl.program_id(0)

    @pl.when(i == 0)
    def _init():
        o_ref[0, 0] = jnp.float32(0.0)

    N = num_rows
    B = batch_size
    tr = row_tile
    row0 = i * tr
    if tr % 8 == 0:
        row0 = pl.multiple_of(row0, 8)

    q = z_ref[pl.ds(row0, tr), :]                      # (tr, Dzp) bf16
    zall = z_ref[...]                                  # (N, Dzp) bf16

    # bf16 operands, f32 accumulation; contract last dims (no transpose).
    sim = jax.lax.dot_general(
        q, zall, dimension_numbers=(((1,), (1,)), ((), ())),
        preferred_element_type=jnp.float32) * inv_temperature   # (tr, N) f32

    gr = row0 + jax.lax.broadcasted_iota(jnp.int32, (tr, N), 0)  # global row id
    col = jax.lax.broadcasted_iota(jnp.int32, (tr, N), 1)

    # Positive logit of global row r is sim[r, (r + B) mod N].
    pos_col = jnp.where(gr < B, gr + B, gr - B)
    pos = jnp.sum(jnp.where(col == pos_col, sim, 0.0), axis=1, keepdims=True)

    # logsumexp over all j != r  (mask kept in f32: -1e30 stays finite).
    masked = jnp.where(gr == col, jnp.float32(-1e30), sim)
    row_max = jnp.max(masked, axis=1, keepdims=True)
    lse = row_max + jnp.log(
        jnp.sum(jnp.exp(masked - row_max), axis=1, keepdims=True))

    o_ref[0, 0] += jnp.sum(lse - pos) / jnp.float32(N)


def nt_xent_loss(z, batch_size, temperature):
    N, Dzp = z.shape
    assert N == 2 * batch_size
    if N > 512 and N % 256 == 0:
        tr = 256
    elif N > 512 and N % 128 == 0:
        tr = 128
    else:
        tr = N                                 # small / odd N: single row tile
    num_tiles = N // tr

    kernel = functools.partial(
        _nt_xent_kernel,
        batch_size=int(batch_size),
        num_rows=int(N),
        row_tile=int(tr),
        inv_temperature=float(1.0 / temperature),
    )
    out = pl.pallas_call(
        kernel,
        out_shape=jax.ShapeDtypeStruct((1, 1), jnp.float32),
        grid=(num_tiles,),
        in_specs=[pl.BlockSpec((N, Dzp), lambda i: (0, 0))],   # z resident
        out_specs=pl.BlockSpec((1, 1), lambda i: (0, 0),
                               memory_space=pltpu.MemorySpace.SMEM),
        compiler_params=pltpu.CompilerParams(
            dimension_semantics=("arbitrary",)),
    )(z)
    return out[0, 0]


# ----------------------------------------------------------------------------
# SimCLR forward (wrapper) — task == 0 branch of Osiris.forward
# ----------------------------------------------------------------------------
def simclr_forward(params, x1, x2, batch_size, temperature):
    B = x1.shape[0]
    assert batch_size == B, "NT-Xent positive indexing assumes batch_size == B"
    # Flatten NCHW -> (B, C*H*W); contiguous reshape only, no copy / no concat.
    x1f = x1.reshape(B, -1)
    x2f = x2.reshape(B, -1)
    z = encode_forward(x1f, x2f, params["bb_w"], params["bb_b"],
                       params["p_w1"], params["p_b1"], params["p_w2"])
    z = z.reshape(2 * B, z.shape[-1])          # (2B, Dzp) bf16, contiguous
    loss = nt_xent_loss(z, B, temperature)
    # matches: loss = [loss, [torch.zeros_like(loss)]]
    return [loss, [jnp.zeros_like(loss)]]


# ----------------------------------------------------------------------------
# Pure-JAX reference (same bf16 operand / f32 accumulation convention)
# ----------------------------------------------------------------------------
def _reference_loss(params, x1, x2, batch_size, temperature):
    bf = jnp.bfloat16

    def mm(a, b):
        return jnp.dot(a.astype(bf), b.astype(bf),
                       preferred_element_type=jnp.float32)

    def encode(x):
        f = mm(x.reshape(x.shape[0], -1), params["bb_w"]) + params["bb_b"]
        h = jnp.maximum(mm(f, params["p_w1"]) + params["p_b1"], 0.0)
        z = mm(h, params["p_w2"])
        inv = jax.lax.rsqrt(
            jnp.maximum(jnp.sum(z * z, axis=1, keepdims=True), 1e-24))
        return (z * inv).astype(bf)            # kernel also stores bf16 z

    z = jnp.concatenate([encode(x1), encode(x2)], axis=0)     # (N, Dz) bf16
    N = 2 * batch_size
    sim = jnp.dot(z, z.T, preferred_element_type=jnp.float32) / temperature
    idx = jnp.arange(N)
    pos = sim[idx, (idx + batch_size) % N]
    masked = jnp.where(jnp.eye(N, dtype=bool), jnp.float32(-1e30), sim)
    row_max = jnp.max(masked, axis=1, keepdims=True)
    lse = (row_max + jnp.log(
        jnp.sum(jnp.exp(masked - row_max), axis=1, keepdims=True)))[:, 0]
    return jnp.sum(lse - pos) / N


# ----------------------------------------------------------------------------
if __name__ == "__main__":
    # small shapes consistent with the forward:
    # x1, x2: (B, C, H, W) NCHW; projector "128-64" => sizes [512, 128, 64]
    B, C, H, W = 2, 4, 16, 16
    DIN = C * H * W          # 1024
    DFEAT = 512              # resnet18 feature dim
    DH, DZ = 128, 64         # projector hidden / output dims
    TEMP = 0.5

    key = jax.random.PRNGKey(0)
    k = jax.random.split(key, 7)
    params = {
        "bb_w": jax.random.normal(k[0], (DIN, DFEAT), jnp.float32) * 0.02,
        "bb_b": jax.random.normal(k[1], (1, DFEAT), jnp.float32) * 0.02,
        "p_w1": jax.random.normal(k[2], (DFEAT, DH), jnp.float32) * 0.05,
        "p_b1": jax.random.normal(k[3], (1, DH), jnp.float32) * 0.05,
        "p_w2": jax.random.normal(k[4], (DH, DZ), jnp.float32) * 0.05,
    }
    x1 = jax.random.normal(k[5], (B, C, H, W), jnp.float32)
    x2 = jax.random.normal(k[6], (B, C, H, W), jnp.float32)

    out = simclr_forward(params, x1, x2, batch_size=B, temperature=TEMP)
    loss = jax.block_until_ready(out[0])
    zero = jax.block_until_ready(out[1][0])

    ref = jax.block_until_ready(_reference_loss(params, x1, x2, B, TEMP))
    assert jnp.allclose(loss, ref, rtol=1e-2, atol=1e-2), (loss, ref)
    assert zero == 0.0

    print("KERNEL_OK")
</pallas_src>

<mosaic_0001>
module attributes {stable_mosaic.version = 11 : i64} {
  func.func @_encode_kernel(%arg0: i32, %arg1: i32, %arg2: memref<2x1024xf32, #tpu.memory_space<vmem>>, %arg3: memref<2x1024xf32, #tpu.memory_space<vmem>>, %arg4: memref<1024x512xbf16, #tpu.memory_space<vmem>>, %arg5: memref<1x512xf32, #tpu.memory_space<vmem>>, %arg6: memref<512x128xbf16, #tpu.memory_space<vmem>>, %arg7: memref<1x128xf32, #tpu.memory_space<vmem>>, %arg8: memref<128x128xbf16, #tpu.memory_space<vmem>>, %arg9: memref<2x2x128xbf16, #tpu.memory_space<vmem>>, %arg10: memref<2x2x512xf32, #tpu.memory_space<vmem>>) attributes {dimension_semantics = [#tpu.dimension_semantics<parallel>, #tpu.dimension_semantics<arbitrary>], iteration_bounds = array<i64: 1, 1>, scalar_prefetch = 0 : i64, scratch_operands = 1 : i64, tpu.core_type = #tpu.core_type<tc>, window_params = [{transform_indices = @transform_0, window_bounds = array<i64: 2, 1024>}, {transform_indices = @transform_1, window_bounds = array<i64: 2, 1024>}, {transform_indices = @transform_2, window_bounds = array<i64: 1024, 512>}, {pipeline_mode = #tpu.pipeline_mode<synchronous>, transform_indices = @transform_3, window_bounds = array<i64: 1, 512>}, {pipeline_mode = #tpu.pipeline_mode<synchronous>, transform_indices = @transform_4, window_bounds = array<i64: 512, 128>}, {pipeline_mode = #tpu.pipeline_mode<synchronous>, transform_indices = @transform_5, window_bounds = array<i64: 1, 128>}, {pipeline_mode = #tpu.pipeline_mode<synchronous>, transform_indices = @transform_6, window_bounds = array<i64: 128, 128>}, {transform_indices = @transform_7, window_bounds = array<i64: 2, 2, 128>}]} {
    %c0_i32 = arith.constant 0 : i32
    %0 = arith.cmpi eq, %arg1, %c0_i32 : i32
    %1 = arith.extui %0 : i1 to i32
    %c0_i32_0 = arith.constant 0 : i32
    %2 = arith.cmpi ne, %1, %c0_i32_0 : i32
    scf.if %2 {
      %cst_20 = arith.constant 0.000000e+00 : f32
      %25 = vector.broadcast %cst_20 : f32 to vector<2x2x512xf32>
      %c0_21 = arith.constant 0 : index
      %c0_22 = arith.constant 0 : index
      %c0_23 = arith.constant 0 : index
      %26 = vector.load %arg10[%c0_21, %c0_22, %c0_23] : memref<2x2x512xf32, #tpu.memory_space<vmem>>, vector<2x2x512xf32>
      tpu.vector_store %arg10[%c0_21, %c0_22, %c0_23], %25 {strides = array<i32>} : memref<2x2x512xf32, #tpu.memory_space<vmem>>, vector<2x2x512xf32>,
    } else {
    }
    %c0 = arith.constant 0 : index
    %c0_1 = arith.constant 0 : index
    %3 = vector.load %arg4[%c0, %c0_1] : memref<1024x512xbf16, #tpu.memory_space<vmem>>, vector<1024x512xbf16>
    %c0_2 = arith.constant 0 : index
    %c0_3 = arith.constant 0 : index
    %c0_4 = arith.constant 0 : index
    %4 = vector.load %arg10[%c0_2, %c0_3, %c0_4] : memref<2x2x512xf32, #tpu.memory_space<vmem>>, vector<1x2x512xf32>
    %5 = vector.shape_cast %4 : vector<1x2x512xf32> to vector<2x512xf32>
    %c0_5 = arith.constant 0 : index
    %c0_6 = arith.constant 0 : index
    %6 = vector.load %arg2[%c0_5, %c0_6] : memref<2x1024xf32, #tpu.memory_space<vmem>>, vector<2x1024xf32>
    %7 = arith.truncf %6 : vector<2x1024xf32> to vector<2x1024xbf16>
    %cst = arith.constant dense<0.000000e+00> : vector<2x512xf32>
    %8 = tpu.matmul %7, %3, %cst {dimension_numbers = #tpu.dot_dimension_numbers<[1], [0], [0], [1], [0, 0, 1, 1], [], []>} : vector<2x1024xbf16>, vector<1024x512xbf16>, vector<2x512xf32> -> vector<2x512xf32>
    %9 = arith.addf %5, %8 : vector<2x512xf32>
    %c0_7 = arith.constant 0 : index
    %c0_8 = arith.constant 0 : index
    %c0_9 = arith.constant 0 : index
    %10 = vector.load %arg10[%c0_7, %c0_8, %c0_9] : memref<2x2x512xf32, #tpu.memory_space<vmem>>, vector<1x2x512xf32>
    %11 = vector.shape_cast %10 : vector<1x2x512xf32> to vector<2x512xf32>
    %12 = vector.shape_cast %9 : vector<2x512xf32> to vector<1x2x512xf32>
    tpu.vector_store %arg10[%c0_7, %c0_8, %c0_9], %12 {strides = array<i32>} : memref<2x2x512xf32, #tpu.memory_space<vmem>>, vector<1x2x512xf32>,
    %c1 = arith.constant 1 : index
    %c0_10 = arith.constant 0 : index
    %c0_11 = arith.constant 0 : index
    %13 = vector.load %arg10[%c1, %c0_10, %c0_11] : memref<2x2x512xf32, #tpu.memory_space<vmem>>, vector<1x2x512xf32>
    %14 = vector.shape_cast %13 : vector<1x2x512xf32> to vector<2x512xf32>
    %c0_12 = arith.constant 0 : index
    %c0_13 = arith.constant 0 : index
    %15 = vector.load %arg3[%c0_12, %c0_13] : memref<2x1024xf32, #tpu.memory_space<vmem>>, vector<2x1024xf32>
    %16 = arith.truncf %15 : vector<2x1024xf32> to vector<2x1024xbf16>
    %cst_14 = arith.constant dense<0.000000e+00> : vector<2x512xf32>
    %17 = tpu.matmul %16, %3, %cst_14 {dimension_numbers = #tpu.dot_dimension_numbers<[1], [0], [0], [1], [0, 0, 1, 1], [], []>} : vector<2x1024xbf16>, vector<1024x512xbf16>, vector<2x512xf32> -> vector<2x512xf32>
    %18 = arith.addf %14, %17 : vector<2x512xf32>
    %c1_15 = arith.constant 1 : index
    %c0_16 = arith.constant 0 : index
    %c0_17 = arith.constant 0 : index
    %19 = vector.load %arg10[%c1_15, %c0_16, %c0_17] : memref<2x2x512xf32, #tpu.memory_space<vmem>>, vector<1x2x512xf32>
    %20 = vector.shape_cast %19 : vector<1x2x512xf32> to vector<2x512xf32>
    %21 = vector.shape_cast %18 : vector<2x512xf32> to vector<1x2x512xf32>
    tpu.vector_store %arg10[%c1_15, %c0_16, %c0_17], %21 {strides = array<i32>} : memref<2x2x512xf32, #tpu.memory_space<vmem>>, vector<1x2x512xf32>,
    %c0_i32_18 = arith.constant 0 : i32
    %22 = arith.cmpi eq, %arg1, %c0_i32_18 : i32
    %23 = arith.extui %22 : i1 to i32
    %c0_i32_19 = arith.constant 0 : i32
    %24 = arith.cmpi ne, %23, %c0_i32_19 : i32
    scf.if %24 {
      %c0_20 = arith.constant 0 : index
      %c0_21 = arith.constant 0 : index
      %25 = vector.load %arg5[%c0_20, %c0_21] : memref<1x512xf32, #tpu.memory_space<vmem>>, vector<1x512xf32>
      %c0_22 = arith.constant 0 : index
      %c0_23 = arith.constant 0 : index
      %26 = vector.load %arg6[%c0_22, %c0_23] : memref<512x128xbf16, #tpu.memory_space<vmem>>, vector<512x128xbf16>
      %c0_24 = arith.constant 0 : index
      %c0_25 = arith.constant 0 : index
      %27 = vector.load %arg7[%c0_24, %c0_25] : memref<1x128xf32, #tpu.memory_space<vmem>>, vector<1x128xf32>
      %c0_26 = arith.constant 0 : index
      %c0_27 = arith.constant 0 : index
      %28 = vector.load %arg8[%c0_26, %c0_27] : memref<128x128xbf16, #tpu.memory_space<vmem>>, vector<128x128xbf16>
      %c0_28 = arith.constant 0 : index
      %c0_29 = arith.constant 0 : index
      %c0_30 = arith.constant 0 : index
      %29 = vector.load %arg10[%c0_28, %c0_29, %c0_30] : memref<2x2x512xf32, #tpu.memory_space<vmem>>, vector<1x2x512xf32>
      %30 = vector.shape_cast %29 : vector<1x2x512xf32> to vector<2x512xf32>
      %31 = vector.broadcast %25 : vector<1x512xf32> to vector<2x512xf32>
      %32 = arith.addf %30, %31 : vector<2x512xf32>
      %33 = arith.truncf %32 : vector<2x512xf32> to vector<2x512xbf16>
      %cst_31 = arith.constant dense<0.000000e+00> : vector<2x128xf32>
      %34 = tpu.matmul %33, %26, %cst_31 {dimension_numbers = #tpu.dot_dimension_numbers<[1], [0], [0], [1], [0, 0, 1, 1], [], []>} : vector<2x512xbf16>, vector<512x128xbf16>, vector<2x128xf32> -> vector<2x128xf32>
      %35 = vector.broadcast %27 : vector<1x128xf32> to vector<2x128xf32>
      %36 = arith.addf %34, %35 : vector<2x128xf32>
      %cst_32 = arith.constant 0.000000e+00 : f32
      %37 = vector.broadcast %cst_32 : f32 to vector<2x128xf32>
      %38 = arith.maximumf %36, %37 : vector<2x128xf32>
      %39 = arith.truncf %38 : vector<2x128xf32> to vector<2x128xbf16>
      %cst_33 = arith.constant dense<0.000000e+00> : vector<2x128xf32>
      %40 = tpu.matmul %39, %28, %cst_33 {dimension_numbers = #tpu.dot_dimension_numbers<[1], [0], [0], [1], [0, 0, 1, 1], [], []>} : vector<2x128xbf16>, vector<128x128xbf16>, vector<2x128xf32> -> vector<2x128xf32>
      %41 = arith.mulf %40, %40 : vector<2x128xf32>
      %cst_34 = arith.constant dense<0.000000e+00> : vector<2xf32>
      %42 = vector.multi_reduction <add>, %41, %cst_34 [1] : vector<2x128xf32> to vector<2xf32>
      %43 = vector.shape_cast %42 : vector<2xf32> to vector<2x1xf32>
      %cst_35 = arith.constant 1.000000e-24 : f32
      %44 = vector.broadcast %cst_35 : f32 to vector<2x1xf32>
      %45 = arith.maximumf %43, %44 : vector<2x1xf32>
      %46 = math.rsqrt %45 : vector<2x1xf32>
      %47 = vector.broadcast %46 : vector<2x1xf32> to vector<2x128xf32>
      %48 = arith.mulf %40, %47 : vector<2x128xf32>
      %49 = arith.truncf %48 : vector<2x128xf32> to vector<2x128xbf16>
      %c0_36 = arith.constant 0 : index
      %c0_37 = arith.constant 0 : index
      %c0_38 = arith.constant 0 : index
      %50 = vector.load %arg9[%c0_36, %c0_37, %c0_38] : memref<2x2x128xbf16, #tpu.memory_space<vmem>>, vector<1x2x128xbf16>
      %51 = vector.shape_cast %50 : vector<1x2x128xbf16> to vector<2x128xbf16>
      %52 = vector.shape_cast %49 : vector<2x128xbf16> to vector<1x2x128xbf16>
      tpu.vector_store %arg9[%c0_36, %c0_37, %c0_38], %52 {strides = array<i32>} : memref<2x2x128xbf16, #tpu.memory_space<vmem>>, vector<1x2x128xbf16>,
      %c1_39 = arith.constant 1 : index
      %c0_40 = arith.constant 0 : index
      %c0_41 = arith.constant 0 : index
      %53 = vector.load %arg10[%c1_39, %c0_40, %c0_41] : memref<2x2x512xf32, #tpu.memory_space<vmem>>, vector<1x2x512xf32>
      %54 = vector.shape_cast %53 : vector<1x2x512xf32> to vector<2x512xf32>
      %55 = vector.broadcast %25 : vector<1x512xf32> to vector<2x512xf32>
      %56 = arith.addf %54, %55 : vector<2x512xf32>
      %57 = arith.truncf %56 : vector<2x512xf32> to vector<2x512xbf16>
      %cst_42 = arith.constant dense<0.000000e+00> : vector<2x128xf32>
      %58 = tpu.matmul %57, %26, %cst_42 {dimension_numbers = #tpu.dot_dimension_numbers<[1], [0], [0], [1], [0, 0, 1, 1], [], []>} : vector<2x512xbf16>, vector<512x128xbf16>, vector<2x128xf32> -> vector<2x128xf32>
      %59 = vector.broadcast %27 : vector<1x128xf32> to vector<2x128xf32>
      %60 = arith.addf %58, %59 : vector<2x128xf32>
      %cst_43 = arith.constant 0.000000e+00 : f32
      %61 = vector.broadcast %cst_43 : f32 to vector<2x128xf32>
      %62 = arith.maximumf %60, %61 : vector<2x128xf32>
      %63 = arith.truncf %62 : vector<2x128xf32> to vector<2x128xbf16>
      %cst_44 = arith.constant dense<0.000000e+00> : vector<2x128xf32>
      %64 = tpu.matmul %63, %28, %cst_44 {dimension_numbers = #tpu.dot_dimension_numbers<[1], [0], [0], [1], [0, 0, 1, 1], [], []>} : vector<2x128xbf16>, vector<128x128xbf16>, vector<2x128xf32> -> vector<2x128xf32>
      %65 = arith.mulf %64, %64 : vector<2x128xf32>
      %cst_45 = arith.constant dense<0.000000e+00> : vector<2xf32>
      %66 = vector.multi_reduction <add>, %65, %cst_45 [1] : vector<2x128xf32> to vector<2xf32>
      %67 = vector.shape_cast %66 : vector<2xf32> to vector<2x1xf32>
      %cst_46 = arith.constant 1.000000e-24 : f32
      %68 = vector.broadcast %cst_46 : f32 to vector<2x1xf32>
      %69 = arith.maximumf %67, %68 : vector<2x1xf32>
      %70 = math.rsqrt %69 : vector<2x1xf32>
      %71 = vector.broadcast %70 : vector<2x1xf32> to vector<2x128xf32>
      %72 = arith.mulf %64, %71 : vector<2x128xf32>
      %73 = arith.truncf %72 : vector<2x128xf32> to vector<2x128xbf16>
      %c1_47 = arith.constant 1 : index
      %c0_48 = arith.constant 0 : index
      %c0_49 = arith.constant 0 : index
      %74 = vector.load %arg9[%c1_47, %c0_48, %c0_49] : memref<2x2x128xbf16, #tpu.memory_space<vmem>>, vector<1x2x128xbf16>
      %75 = vector.shape_cast %74 : vector<1x2x128xbf16> to vector<2x128xbf16>
      %76 = vector.shape_cast %73 : vector<2x128xbf16> to vector<1x2x128xbf16>
      tpu.vector_store %arg9[%c1_47, %c0_48, %c0_49], %76 {strides = array<i32>} : memref<2x2x128xbf16, #tpu.memory_space<vmem>>, vector<1x2x128xbf16>,
    } else {
    }
    return
  }
  func.func @transform_0(%arg0: i32, %arg1: i32) -> (i32, i32) {
    %c0_i32 = arith.constant 0 : i32
    return %arg0, %arg1 : i32, i32
  }
  func.func @transform_1(%arg0: i32, %arg1: i32) -> (i32, i32) {
    %c0_i32 = arith.constant 0 : i32
    return %arg0, %arg1 : i32, i32
  }
  func.func @transform_2(%arg0: i32, %arg1: i32) -> (i32, i32) {
    %c0_i32 = arith.constant 0 : i32
    %c0_i32_0 = arith.constant 0 : i32
    return %arg1, %c0_i32 : i32, i32
  }
  func.func @transform_3(%arg0: i32, %arg1: i32) -> (i32, i32) {
    %c0_i32 = arith.constant 0 : i32
    %c0_i32_0 = arith.constant 0 : i32
    %c0_i32_1 = arith.constant 0 : i32
    return %c0_i32, %c0_i32_0 : i32, i32
  }
  func.func @transform_4(%arg0: i32, %arg1: i32) -> (i32, i32) {
    %c0_i32 = arith.constant 0 : i32
    %c0_i32_0 = arith.constant 0 : i32
    %c0_i32_1 = arith.constant 0 : i32
    return %c0_i32, %c0_i32_0 : i32, i32
  }
  func.func @transform_5(%arg0: i32, %arg1: i32) -> (i32, i32) {
    %c0_i32 = arith.constant 0 : i32
    %c0_i32_0 = arith.constant 0 : i32
    %c0_i32_1 = arith.constant 0 : i32
    return %c0_i32, %c0_i32_0 : i32, i32
  }
  func.func @transform_6(%arg0: i32, %arg1: i32) -> (i32, i32) {
    %c0_i32 = arith.constant 0 : i32
    %c0_i32_0 = arith.constant 0 : i32
    %c0_i32_1 = arith.constant 0 : i32
    return %c0_i32, %c0_i32_0 : i32, i32
  }
  func.func @transform_7(%arg0: i32, %arg1: i32) -> (i32, i32, i32) {
    %c0_i32 = arith.constant 0 : i32
    %c0_i32_0 = arith.constant 0 : i32
    %c0_i32_1 = arith.constant 0 : i32
    return %c0_i32, %arg0, %c0_i32_0 : i32, i32, i32
  }
}

</mosaic_0001>

<bundles_post_ra>
// kernel: tpu_custom_call.1
= control target key start
LH: loop header
LB: loop body
LE: loop exit
PB: predicated region body
PF: predicated region fallthrough
CT: control target
= control target key end

     0   :  { %12 = vsyncpa [#allocation4], 0  ;;  %s5080_s0 = inlined_call_operand.hbm [shape: f32[2,1024], index: 0, kind: input, shape index: {}]   ;;  %s5081_s1 = inlined_call_operand.hbm [shape: f32[2,1024], index: 1, kind: input, shape index: {}]   ;;  %s5082_s2 = inlined_call_operand.hbm [shape: bf16[1024,512], index: 2, kind: input, shape index: {}]   ;;  %s5083_s3 = inlined_call_operand.vmem [shape: f32[1,512], index: 3, kind: input, shape index: {}]   ;;  %s5084_s4 = inlined_call_operand.hbm [shape: bf16[512,128], index: 4, kind: input, shape index: {}]   ;;  %s5085_s5 = inlined_call_operand.vmem [shape: f32[1,128], index: 5, kind: input, shape index: {}]   ;;  %s5086_s6 = inlined_call_operand.hbm [shape: bf16[128,128], index: 6, kind: input, shape index: {}]   ;;  %s5087_s7 = inlined_call_operand.hbm [shape: bf16[2,2,128], index: 7, kind: output, shape index: {}]  }
   0x1   :  { %13 = vsyncpa [#allocation7], 0 }
   0x2   :  { %14 = vsyncpa [#allocation10], 0 }
   0x3   :  { %15 = vsyncpa [#allocation5], 0  ;;  %s4337_s24 = smov [#allocation6]   ;;  %s4338_s26 = smov [#allocation9]  }
   0x4   :  { %s32_s25 = sshll.u32 %s4337_s24, 4  ;;  %s55_s27 = sshll.u32 %s4338_s26, 4  ;;  %s33_s25 = int_to_ptr.vmem [resolvable:$true] %s32_s25  ;;  %s56_s27 = int_to_ptr.vmem [resolvable:$true] %s55_s27 }
   0x5   :  { %s4217_s28 = scalar_lea.vmem %s33_s25, 256  ;;  %p4222_p1 = scmp.lt.s32.totalorder %s33_s25, %s33_s25 }
   0x6   :  { %p4218_p0 = scmp.ne.s32.totalorder %s33_s25, %s4217_s28  ;;  %p4223_p2 = scmp.lt.s32.totalorder %s4217_s28, %s4217_s28 }
   0x8   :  { %p4224_p3 = por %p4223_p2, %p4222_p1 }
   0xa   :  { %p4225_p4 = pnand %p4224_p3, %p4218_p0 }
   0xc   :  { %4228 = shalt.err (!%p4225_p4)
}
   0xd   :  { %35 = dma.hbm_to_vmem [thread:$0]  %s5081_s1, 256, %s33_s25, [#allocation7]  }
   0xe   :  { %s4237_s8 = scalar_lea.vmem %s56_s27, 4096  ;;  %p4242_p6 = scmp.lt.s32.totalorder %s56_s27, %s56_s27 }
   0xf   :  { %p4238_p5 = scmp.ne.s32.totalorder %s56_s27, %s4237_s8  ;;  %p4243_p7 = scmp.lt.s32.totalorder %s4237_s8, %s4237_s8 }
  0x11   :  { %p4244_p8 = por %p4243_p7, %p4242_p6 }
  0x13   :  { %p4245_p9 = pnand %p4244_p8, %p4238_p5 }
  0x15   :  { %4248 = shalt.err (!%p4245_p9)
}
  0x16   :  { %s4339_s9 = smov 64   ;;  %s4340_s10 = smov 4  }
  0x17   :  { %61 = dma.hbm_to_vmem [thread:$0]  %s5084_s4, 4096, %s56_s27, [#allocation10], %s4339_s9, %s4339_s9, %s4340_s10  }
  0x18   :  { %s4341_s13 = smov [#allocation3]   ;;  %s4342_s15 = smov [#allocation8]  }
  0x19   :  { %s22_s14 = sshll.u32 %s4341_s13, 4  ;;  %s41_s1 = sshll.u32 %s4342_s15, 4  ;;  %s23_s14 = int_to_ptr.vmem [resolvable:$true] %s22_s14  ;;  %s42_s1 = int_to_ptr.vmem [resolvable:$true] %s41_s1 }
  0x1a   :  { %s4257_s16 = scalar_lea.vmem %s23_s14, 256  ;;  %p4262_p11 = scmp.lt.s32.totalorder %s23_s14, %s23_s14 }
  0x1b   :  { %p4258_p10 = scmp.ne.s32.totalorder %s23_s14, %s4257_s16  ;;  %p4263_p12 = scmp.lt.s32.totalorder %s4257_s16, %s4257_s16 }
  0x1d   :  { %p4264_p13 = por %p4263_p12, %p4262_p11 }
  0x1f   :  { %p4265_p0 = pnand %p4264_p13, %p4258_p10 }
  0x21   :  { %4268 = shalt.err (!%p4265_p0)
}
  0x22   :  { %25 = dma.hbm_to_vmem [thread:$0]  %s5080_s0, 256, %s23_s14, [#allocation4]  }
  0x23   :  { %s4277_s19 = scalar_lea.vmem %s42_s1, 32768  ;;  %p4282_p2 = scmp.lt.s32.totalorder %s42_s1, %s42_s1 }
  0x24   :  { %p4278_p1 = scmp.ne.s32.totalorder %s42_s1, %s4277_s19  ;;  %p4283_p3 = scmp.lt.s32.totalorder %s4277_s19, %s4277_s19 }
  0x26   :  { %p4284_p4 = por %p4283_p3, %p4282_p2 }
  0x28   :  { %p4285_p5 = pnand %p4284_p4, %p4278_p1 }
  0x2a   :  { %4288 = shalt.err (!%p4285_p5)
}
  0x2b   :  { %s4343_s4 = smov 256   ;;  %s4344_s20 = smov 16  }
  0x2c   :  { %47 = dma.hbm_to_vmem [thread:$0]  %s5082_s2, 32768, %s42_s1, [#allocation7], %s4343_s4, %s4343_s4, %s4344_s20  }
  0x2d   :  { %s4345_s23 = smov [#allocation11]  }
  0x2e   :  { %s69_s24 = sshll.u32 %s4345_s23, 4  ;;  %s70_s24 = int_to_ptr.vmem [resolvable:$true] %s69_s24 }
  0x2f   :  { %s4297_s25 = scalar_lea.vmem %s70_s24, 1024  ;;  %p4302_p7 = scmp.lt.s32.totalorder %s70_s24, %s70_s24 }
  0x30   :  { %p4298_p6 = scmp.ne.s32.totalorder %s70_s24, %s4297_s25  ;;  %p4303_p8 = scmp.lt.s32.totalorder %s4297_s25, %s4297_s25 }
  0x32   :  { %p4304_p9 = por %p4303_p8, %p4302_p7 }
  0x34   :  { %p4305_p10 = pnand %p4304_p9, %p4298_p6 }
  0x36   :  { %4308 = shalt.err (!%p4305_p10)
}
  0x37   :  { %75 = dma.hbm_to_vmem [thread:$0]  %s5086_s6, 1024, %s70_s24, [#allocation10], %s4339_s9, %s4339_s9, %s4340_s10  }
  0x38   :  { %4329 = dma.done.wait [#allocation4], 256  }
  0x39   :  { %4330 = vsyncadd [#allocation4], 4294967040 }
  0x3a   :  { %4331 = dma.done.wait [#allocation7], 33024  }
  0x3b   :  { %4332 = vsyncadd [#allocation7], 4294934272 }
  0x3c   :  { %4333 = dma.done.wait [#allocation10], 5120  }
  0x3d   :  { %4334 = vsyncadd [#allocation10], 4294962176  ;;  %v3611_v0 = vld [vmem:[#allocation8 + $0xe4] ss:$16 sps:$4 sm:$0xff]   ;;  %v3615_v2 = vld [vmem:[#allocation8 + $0xe0] ss:$16 sps:$4 sm:$0xff]   ;;  %v363_v38 = vlaneseq }
  0x3e   :  { %v3613_v1 = vld [vmem:[#allocation8 + $0x2e4] ss:$16 sps:$4 sm:$0xff]   ;;  %1689 = vmatprep.subr.bf16.mxu0 %v3611_v0  ;;  %v3616_v3 = vld [vmem:[#allocation8 + $0x2e0] ss:$16 sps:$4 sm:$0xff]   ;;  %v4346_v36 = vmov 1983009808  }
  0x3f   :  { %1730 = vmatprep.subr.bf16.mxu1 %v3613_v1  ;;  %v3617_v4 = vld [vmem:[#allocation8 + $0xc4] ss:$16 sps:$4 sm:$0xff]   ;;  %1690 = vmatpush1.bf16.msra.mxu0 %v3615_v2  ;;  %v3621_v6 = vld [vmem:[#allocation8 + $0xc0] ss:$16 sps:$4 sm:$0xff]   ;;  %v361_v37 = vunpack.c.l.s4 %v4346_v36  ;;  %v4413_v43 = vshrl.u32 %v363_v38, 7  ;;  %vm4348_vm0 = vmmov 0  }
  0x40   :  { %1731 = vmatpush1.bf16.msra.mxu1 %v3616_v3  ;;  %v3619_v5 = vld [vmem:[#allocation8 + $0x2c4] ss:$16 sps:$4 sm:$0xff]   ;;  %1691 = vmatprep.subr.bf16.mxu0 %v3617_v4  ;;  %v3622_v7 = vld [vmem:[#allocation8 + $0x2c0] ss:$16 sps:$4 sm:$0xff]   ;;  %vm2966_vm1 = vcmask 1041408  }
  0x41   :  { %1732 = vmatprep.subr.bf16.mxu1 %v3619_v5  ;;  %v3623_v8 = vld [vmem:[#allocation8 + $0xa4] ss:$16 sps:$4 sm:$0xff]   ;;  %v3627_v10 = vld [vmem:[#allocation8 + $0xa0] ss:$16 sps:$4 sm:$0xff]   ;;  %v362_v42 = vunpack.c.0.s8 %v361_v37  ;;  %5141 = vst [vmem:[#allocation17_spill] sm:$0xff] %v4413_v43 }
  0x42   :  { %v3625_v9 = vld [vmem:[#allocation8 + $0x2a4] ss:$16 sps:$4 sm:$0xff]   ;;  %v3628_v11 = vld [vmem:[#allocation8 + $0x2a0] ss:$16 sps:$4 sm:$0xff]  }
  0x43   :  { %1692 = vmatpush1.bf16.msra.mxu0 %v3621_v6  ;;  %v3629_v12 = vld [vmem:[#allocation8 + $0x84] ss:$16 sps:$4 sm:$0xff]   ;;  %v3633_v14 = vld [vmem:[#allocation8 + $0x80] ss:$16 sps:$4 sm:$0xff]   ;;  %v4416_v49 = vsub.s32 %v362_v42, %v4413_v43  ;;  %v356_v42 = vld [vmem:[#allocation3 + $0x8] sm:$0xff] }
  0x44   :  { %1733 = vmatpush1.bf16.msra.mxu1 %v3622_v7  ;;  %1693 = vmatprep.subr.bf16.mxu0 %v3623_v8  ;;  %v3631_v13 = vld [vmem:[#allocation8 + $0x284] ss:$16 sps:$4 sm:$0xff]   ;;  %v3634_v15 = vld [vmem:[#allocation8 + $0x280] ss:$16 sps:$4 sm:$0xff]   ;;  %v4642_v43 = vld [vmem:[#allocation8 + $0x5e8] ss:$16 sps:$4 sm:$0xff]  }
  0x45   :  { %1734 = vmatprep.subr.bf16.mxu1 %v3625_v9  ;;  %v3635_v16 = vld [vmem:[#allocation8 + $0x64] ss:$16 sps:$4 sm:$0xff]   ;;  %v3639_v18 = vld [vmem:[#allocation8 + $0x60] ss:$16 sps:$4 sm:$0xff]   ;;  %5163 = vst [vmem:[#allocation39_spill] sm:$0xff] %v4642_v43 }
  0x46   :  { %v3637_v17 = vld [vmem:[#allocation8 + $0x264] ss:$16 sps:$4 sm:$0xff]   ;;  %v3640_v19 = vld [vmem:[#allocation8 + $0x260] ss:$16 sps:$4 sm:$0xff]  }
  0x47   :  { %1694 = vmatpush1.bf16.msra.mxu0 %v3627_v10  ;;  %v3641_v20 = vld [vmem:[#allocation8 + $0x44] ss:$16 sps:$4 sm:$0xff]   ;;  %v3645_v22 = vld [vmem:[#allocation8 + $0x40] ss:$16 sps:$4 sm:$0xff]  }
  0x48   :  { %1735 = vmatpush1.bf16.msra.mxu1 %v3628_v11  ;;  %1695 = vmatprep.subr.bf16.mxu0 %v3629_v12  ;;  %v3643_v21 = vld [vmem:[#allocation8 + $0x244] ss:$16 sps:$4 sm:$0xff]   ;;  %v3646_v23 = vld [vmem:[#allocation8 + $0x240] ss:$16 sps:$4 sm:$0xff]  }
  0x49   :  { %1736 = vmatprep.subr.bf16.mxu1 %v3631_v13  ;;  %v3647_v24 = vld [vmem:[#allocation8 + $0x24] ss:$16 sps:$4 sm:$0xff]   ;;  %v3651_v26 = vld [vmem:[#allocation8 + $0x20] ss:$16 sps:$4 sm:$0xff]  }
  0x4a   :  { %v3649_v25 = vld [vmem:[#allocation8 + $0x224] ss:$16 sps:$4 sm:$0xff]   ;;  %v3652_v27 = vld [vmem:[#allocation8 + $0x220] ss:$16 sps:$4 sm:$0xff]  }
  0x4b   :  { %1696 = vmatpush1.bf16.msra.mxu0 %v3633_v14  ;;  %v3653_v28 = vld [vmem:[#allocation8 + $0x4] ss:$16 sps:$4 sm:$0xff]   ;;  %v3657_v30 = vld [vmem:[#allocation8] ss:$16 sps:$4 sm:$0xff]  }
  0x4c   :  { %1737 = vmatpush1.bf16.msra.mxu1 %v3634_v15  ;;  %1697 = vmatprep.subr.bf16.mxu0 %v3635_v16  ;;  %v3655_v29 = vld [vmem:[#allocation8 + $0x204] ss:$16 sps:$4 sm:$0xff]   ;;  %v3658_v31 = vld [vmem:[#allocation8 + $0x200] ss:$16 sps:$4 sm:$0xff]  }
  0x4d   :  { %1738 = vmatprep.subr.bf16.mxu1 %v3637_v17  ;;  %v3659_v32 = vld [vmem:[#allocation8 + $0x1e4] ss:$16 sps:$4 sm:$0xff]   ;;  %v3663_v34 = vld [vmem:[#allocation8 + $0x1e0] ss:$16 sps:$4 sm:$0xff]  }
  0x4e   :  { %v3661_v33 = vld [vmem:[#allocation8 + $0x3e4] ss:$16 sps:$4 sm:$0xff]   ;;  %v3664_v35 = vld [vmem:[#allocation8 + $0x3e0] ss:$16 sps:$4 sm:$0xff]  }
  0x4f   :  { %1698 = vmatpush1.bf16.msra.mxu0 %v3639_v18  ;;  %v3665_v39 = vld [vmem:[#allocation8 + $0x1c4] ss:$16 sps:$4 sm:$0xff]   ;;  %v3669_v41 = vld [vmem:[#allocation8 + $0x1c0] ss:$16 sps:$4 sm:$0xff]  }
  0x50   :  { %1739 = vmatpush1.bf16.msra.mxu1 %v3640_v19  ;;  %1699 = vmatprep.subr.bf16.mxu0 %v3641_v20  ;;  %v3667_v40 = vld [vmem:[#allocation8 + $0x3c4] ss:$16 sps:$4 sm:$0xff]   ;;  %v3670_v44 = vld [vmem:[#allocation8 + $0x3c0] ss:$16 sps:$4 sm:$0xff]  }
  0x51   :  { %1740 = vmatprep.subr.bf16.mxu1 %v3643_v21  ;;  %v3671_v45 = vld [vmem:[#allocation8 + $0x1a4] ss:$16 sps:$4 sm:$0xff]   ;;  %v3675_v47 = vld [vmem:[#allocation8 + $0x1a0] ss:$16 sps:$4 sm:$0xff]  }
  0x52   :  { %v3673_v46 = vld [vmem:[#allocation8 + $0x3a4] ss:$16 sps:$4 sm:$0xff]   ;;  %v3676_v48 = vld [vmem:[#allocation8 + $0x3a0] ss:$16 sps:$4 sm:$0xff]  }
  0x53   :  { %1700 = vmatpush1.bf16.msra.mxu0 %v3645_v22  ;;  %v3677_v50 = vld [vmem:[#allocation8 + $0x184] ss:$16 sps:$4 sm:$0xff]   ;;  %v3681_v53 = vld [vmem:[#allocation8 + $0x180] ss:$16 sps:$4 sm:$0xff]  }
  0x54   :  { %1741 = vmatpush1.bf16.msra.mxu1 %v3646_v23  ;;  %1701 = vmatprep.subr.bf16.mxu0 %v3647_v24  ;;  %v3679_v51 = vld [vmem:[#allocation8 + $0x384] ss:$16 sps:$4 sm:$0xff]   ;;  %v3682_v56 = vld [vmem:[#allocation8 + $0x380] ss:$16 sps:$4 sm:$0xff]  }
  0x55   :  { %1742 = vmatprep.subr.bf16.mxu1 %v3649_v25  ;;  %v355_v52 = vld [vmem:[#allocation3] sm:$0xff] }
  0x56   :  { %v366_v54 = vrot.slane %v355_v52, %v4416_v49  ;;  %v359_v55 = vcombine.high %v355_v52, %v355_v52  ;;  %v3683_v57 = vld [vmem:[#allocation8 + $0x164] ss:$16 sps:$4 sm:$0xff]   ;;  %v3687_v61 = vld [vmem:[#allocation8 + $0x160] ss:$16 sps:$4 sm:$0xff]  }
  0x57   :  { %1702 = vmatpush1.bf16.msra.mxu0 %v3651_v26  ;;  %v3685_v58 = vld [vmem:[#allocation8 + $0x364] ss:$16 sps:$4 sm:$0xff]   ;;  %v3688_v0 = vld [vmem:[#allocation8 + $0x360] ss:$16 sps:$4 sm:$0xff]  }
  0x58   :  { %1743 = vmatpush1.bf16.msra.mxu1 %v3652_v27  ;;  %1703 = vmatprep.subr.bf16.mxu0 %v3653_v28  ;;  %v374_v59 = vcombine.high %v366_v54, %v366_v54  ;;  %v373_v60 = vrot.slane %v359_v55, %v4416_v49  ;;  %v3689_v1 = vld [vmem:[#allocation8 + $0x144] ss:$16 sps:$4 sm:$0xff]   ;;  %v3693_v4 = vld [vmem:[#allocation8 + $0x140] ss:$16 sps:$4 sm:$0xff]   ;;  %v4426_v16 = vpack.c.bf16 %v366_v54, %v366_v54 }
  0x59   :  { %1744 = vmatprep.subr.bf16.mxu1 %v3655_v29  ;;  %v3691_v2 = vld [vmem:[#allocation8 + $0x344] ss:$16 sps:$4 sm:$0xff]   ;;  %v3694_v5 = vld [vmem:[#allocation8 + $0x340] ss:$16 sps:$4 sm:$0xff]  }
  0x5a   :  { %v4420_v62 = vpack.c.bf16 %v374_v59, %v374_v59  ;;  %v375_v63 = vcombine.high %v373_v60, %v373_v60  ;;  %v3695_v6 = vld [vmem:[#allocation8 + $0x124] ss:$16 sps:$4 sm:$0xff]   ;;  %v3699_v8 = vld [vmem:[#allocation8 + $0x120] ss:$16 sps:$4 sm:$0xff]   ;;  %v4428_v17 = vpack.c.bf16 %v373_v60, %v373_v60 }
  0x5b   :  { %1704 = vmatpush1.bf16.msra.mxu0 %v3657_v30  ;;  %v3697_v7 = vld [vmem:[#allocation8 + $0x324] ss:$16 sps:$4 sm:$0xff]   ;;  %v3700_v9 = vld [vmem:[#allocation8 + $0x320] ss:$16 sps:$4 sm:$0xff]  }
  0x5c   :  { %1745 = vmatpush1.bf16.msra.mxu1 %v3658_v31  ;;  %1705 = vmatprep.subr.bf16.mxu0 %v3659_v32  ;;  %v4422_v3 = vpack.c.bf16 %v375_v63, %v375_v63  ;;  %v3701_v10 = vld [vmem:[#allocation8 + $0x104] ss:$16 sps:$4 sm:$0xff]   ;;  %v3705_v12 = vld [vmem:[#allocation8 + $0x100] ss:$16 sps:$4 sm:$0xff]  }
  0x5d   :  { %1746 = vmatprep.subr.bf16.mxu1 %v3661_v33  ;;  %1721 = vmatprep.mubr.bf16.mxu0 %v4420_v62  ;;  %v3703_v11 = vld [vmem:[#allocation8 + $0x304] ss:$16 sps:$4 sm:$0xff]   ;;  %v3706_v13 = vld [vmem:[#allocation8 + $0x300] ss:$16 sps:$4 sm:$0xff]  }
  0x5e   :  { %1762 = vmatprep.mubr.bf16.mxu1 %v4422_v3  ;;  %v3710_v14 = vld [vmem:[#allocation8 + $0x4e4] ss:$16 sps:$4 sm:$0xff]   ;;  %v3708_v18 = vld [vmem:[#allocation8 + $0x4e0] ss:$16 sps:$4 sm:$0xff]  }
  0x5f   :  { %1706 = vmatpush2.bf16.msra.mxu0 %v3663_v34  ;;  %v3713_v15 = vld [vmem:[#allocation8 + $0x6e4] ss:$16 sps:$4 sm:$0xff]   ;;  %v3711_v19 = vld [vmem:[#allocation8 + $0x6e0] ss:$16 sps:$4 sm:$0xff]  }
  0x60   :  { %1747 = vmatpush2.bf16.msra.mxu1 %v3664_v35  ;;  %1707 = vmatprep.subr.bf16.mxu0 %v3665_v39  ;;  %v3716_v20 = vld [vmem:[#allocation8 + $0x4c4] ss:$16 sps:$4 sm:$0xff]   ;;  %v3714_v22 = vld [vmem:[#allocation8 + $0x4c0] ss:$16 sps:$4 sm:$0xff]  }
  0x61   :  { %1748 = vmatprep.subr.bf16.mxu1 %v3667_v40  ;;  %v3719_v21 = vld [vmem:[#allocation8 + $0x6c4] ss:$16 sps:$4 sm:$0xff]   ;;  %v3717_v23 = vld [vmem:[#allocation8 + $0x6c0] ss:$16 sps:$4 sm:$0xff]  }
  0x62   :  { %v3722_v24 = vld [vmem:[#allocation8 + $0x4a4] ss:$16 sps:$4 sm:$0xff]   ;;  %v3720_v26 = vld [vmem:[#allocation8 + $0x4a0] ss:$16 sps:$4 sm:$0xff]  }
  0x63   :  { %1708 = vmatpush2.bf16.msra.mxu0 %v3669_v41  ;;  %v3725_v25 = vld [vmem:[#allocation8 + $0x6a4] ss:$16 sps:$4 sm:$0xff]   ;;  %v3723_v27 = vld [vmem:[#allocation8 + $0x6a0] ss:$16 sps:$4 sm:$0xff]  }
  0x64   :  { %1749 = vmatpush2.bf16.msra.mxu1 %v3670_v44  ;;  %1709 = vmatprep.subr.bf16.mxu0 %v3671_v45  ;;  %v3728_v28 = vld [vmem:[#allocation8 + $0x484] ss:$16 sps:$4 sm:$0xff]   ;;  %v3726_v30 = vld [vmem:[#allocation8 + $0x480] ss:$16 sps:$4 sm:$0xff]   ;;  %v4433_v44 = vrot.slane %v356_v42, %v4416_v49  ;;  %v376_v45 = vcombine.high %v356_v42, %v356_v42  ;;  %v3817_v42 = vld [vmem:[#allocation8 + $0xa8] ss:$16 sps:$4 sm:$0xff]  }
  0x65   :  { %1750 = vmatprep.subr.bf16.mxu1 %v3673_v46  ;;  %v3731_v29 = vld [vmem:[#allocation8 + $0x684] ss:$16 sps:$4 sm:$0xff]   ;;  %v3729_v31 = vld [vmem:[#allocation8 + $0x680] ss:$16 sps:$4 sm:$0xff]  }
  0x66   :  { %v3734_v32 = vld [vmem:[#allocation8 + $0x464] ss:$16 sps:$4 sm:$0xff]   ;;  %v3732_v34 = vld [vmem:[#allocation8 + $0x460] ss:$16 sps:$4 sm:$0xff]  }
  0x67   :  { %1710 = vmatpush2.bf16.msra.mxu0 %v3675_v47  ;;  %v3737_v33 = vld [vmem:[#allocation8 + $0x664] ss:$16 sps:$4 sm:$0xff]   ;;  %v3735_v35 = vld [vmem:[#allocation8 + $0x660] ss:$16 sps:$4 sm:$0xff]  }
  0x68   :  { %1751 = vmatpush2.bf16.msra.mxu1 %v3676_v48  ;;  %1711 = vmatprep.subr.bf16.mxu0 %v3677_v50  ;;  %v3740_v36 = vld [vmem:[#allocation8 + $0x444] ss:$16 sps:$4 sm:$0xff]   ;;  %v3738_v38 = vld [vmem:[#allocation8 + $0x440] ss:$16 sps:$4 sm:$0xff]   ;;  %v391_v48 = vcombine.high %v4433_v44, %v4433_v44  ;;  %v4438_v50 = vrot.slane %v376_v45, %v4416_v49  ;;  %v3825_v45 = vld [vmem:[#allocation8 + $0x8c] ss:$16 sps:$4 sm:$0xff]  }
  0x69   :  { %1752 = vmatprep.subr.bf16.mxu1 %v3679_v51  ;;  %v3743_v37 = vld [vmem:[#allocation8 + $0x644] ss:$16 sps:$4 sm:$0xff]   ;;  %v3741_v39 = vld [vmem:[#allocation8 + $0x640] ss:$16 sps:$4 sm:$0xff]  }
  0x6a   :  { %v3746_v40 = vld [vmem:[#allocation8 + $0x424] ss:$16 sps:$4 sm:$0xff]   ;;  %v3744_v46 = vld [vmem:[#allocation8 + $0x420] ss:$16 sps:$4 sm:$0xff]   ;;  %v392_v54 = vcombine.high %v4438_v50, %v4438_v50 }
  0x6b   :  { %1712 = vmatpush2.bf16.msra.mxu0 %v3681_v53  ;;  %v3749_v41 = vld [vmem:[#allocation8 + $0x624] ss:$16 sps:$4 sm:$0xff]   ;;  %v3747_v47 = vld [vmem:[#allocation8 + $0x620] ss:$16 sps:$4 sm:$0xff]   ;;  %v4440_v53 = vpack.c.bf16 %v391_v48, %v391_v48  ;;  %v3826_v48 = vld [vmem:[#allocation8 + $0x288] ss:$16 sps:$4 sm:$0xff]  }
  0x6c   :  { %1753 = vmatpush2.bf16.msra.mxu1 %v3682_v56  ;;  %1713 = vmatprep.subr.bf16.mxu0 %v3683_v57  ;;  %v3752_v51 = vld [vmem:[#allocation8 + $0x404] ss:$16 sps:$4 sm:$0xff]   ;;  %v3750_v55 = vld [vmem:[#allocation8 + $0x400] ss:$16 sps:$4 sm:$0xff]   ;;  %v4444_v57 = vpack.c.bf16 %v392_v54, %v392_v54  ;;  %v3840_v54 = vld [vmem:[#allocation8 + $0x24c] ss:$16 sps:$4 sm:$0xff]  }
  0x6d   :  { %1754 = vmatprep.subr.bf16.mxu1 %v3685_v58  ;;  %v3755_v52 = vld [vmem:[#allocation8 + $0x604] ss:$16 sps:$4 sm:$0xff]   ;;  %v3753_v56 = vld [vmem:[#allocation8 + $0x600] ss:$16 sps:$4 sm:$0xff]  }
  0x6e   :  { %v3758_v58 = vld [vmem:[#allocation8 + $0x5e4] ss:$16 sps:$4 sm:$0xff]   ;;  %v3756_v60 = vld [vmem:[#allocation8 + $0x5e0] ss:$16 sps:$4 sm:$0xff]  }
  0x6f   :  { %1714 = vmatpush2.bf16.msra.mxu0 %v3687_v61  ;;  %v3761_v59 = vld [vmem:[#allocation8 + $0x7e4] ss:$16 sps:$4 sm:$0xff]   ;;  %v3759_v61 = vld [vmem:[#allocation8 + $0x7e0] ss:$16 sps:$4 sm:$0xff]  }
  0x70   :  { %1755 = vmatpush2.bf16.msra.mxu1 %v3688_v0  ;;  %1715 = vmatprep.subr.bf16.mxu0 %v3689_v1  ;;  %v3764_v63 = vld [vmem:[#allocation8 + $0x5c4] ss:$16 sps:$4 sm:$0xff]   ;;  %v3762_v1 = vld [vmem:[#allocation8 + $0x5c0] ss:$16 sps:$4 sm:$0xff]  }
  0x71   :  { %1756 = vmatprep.subr.bf16.mxu1 %v3691_v2  ;;  %v3767_v0 = vld [vmem:[#allocation8 + $0x7c4] ss:$16 sps:$4 sm:$0xff]   ;;  %v3765_v2 = vld [vmem:[#allocation8 + $0x7c0] ss:$16 sps:$4 sm:$0xff]  }
  0x73   :  { %1716 = vmatpush2.bf16.msra.mxu0 %v3693_v4  ;;  %v3770_v4 = vld [vmem:[#allocation8 + $0x5a4] ss:$16 sps:$4 sm:$0xff]  }
  0x74   :  { %1757 = vmatpush2.bf16.msra.mxu1 %v3694_v5  ;;  %1717 = vmatprep.subr.bf16.mxu0 %v3695_v6  ;;  %v3773_v5 = vld [vmem:[#allocation8 + $0x7a4] ss:$16 sps:$4 sm:$0xff]   ;;  %v3768_v6 = vld [vmem:[#allocation8 + $0x5a0] ss:$16 sps:$4 sm:$0xff]  }
  0x75   :  { %1758 = vmatprep.subr.bf16.mxu1 %v3697_v7  ;;  %v3771_v7 = vld [vmem:[#allocation8 + $0x7a0] ss:$16 sps:$4 sm:$0xff]  }
  0x77   :  { %1718 = vmatpush2.bf16.msra.mxu0 %v3699_v8  ;;  %v3776_v8 = vld [vmem:[#allocation8 + $0x584] ss:$16 sps:$4 sm:$0xff]  }
  0x78   :  { %1759 = vmatpush2.bf16.msra.mxu1 %v3700_v9  ;;  %1719 = vmatprep.subr.bf16.mxu0 %v3701_v10  ;;  %v3779_v9 = vld [vmem:[#allocation8 + $0x784] ss:$16 sps:$4 sm:$0xff]   ;;  %v3774_v10 = vld [vmem:[#allocation8 + $0x580] ss:$16 sps:$4 sm:$0xff]  }
  0x79   :  { %1760 = vmatprep.subr.bf16.mxu1 %v3703_v11  ;;  %v3777_v11 = vld [vmem:[#allocation8 + $0x780] ss:$16 sps:$4 sm:$0xff]  }
  0x7b   :  { %1720 = vmatpush2.bf16.msra.mxu0 %v3705_v12  ;;  %v3782_v12 = vld [vmem:[#allocation8 + $0x564] ss:$16 sps:$4 sm:$0xff]  }
  0x7c   :  { %1761 = vmatpush2.bf16.msra.mxu1 %v3706_v13  ;;  %1771 = vmatprep.subr.bf16.mxu0 %v3710_v14  ;;  %v3785_v13 = vld [vmem:[#allocation8 + $0x764] ss:$16 sps:$4 sm:$0xff]   ;;  %v3780_v14 = vld [vmem:[#allocation8 + $0x560] ss:$16 sps:$4 sm:$0xff]  }
  0x7d   :  { %1812 = vmatprep.subr.bf16.mxu1 %v3713_v15  ;;  %v3783_v15 = vld [vmem:[#allocation8 + $0x760] ss:$16 sps:$4 sm:$0xff]  }
  0x7e   :  { %1722 = vmatmul.mubr.bf16.vlgmr.msra.gmra.mxu0 %v4426_v16 }
  0x7f   :  { %1763 = vmatmul.mubr.bf16.vlgmr.msra.gmra.mxu1 %v4428_v17  ;;  %1772 = vmatpush1.bf16.msra.mxu0 %v3708_v18  ;;  %v3788_v18 = vld [vmem:[#allocation8 + $0x544] ss:$16 sps:$4 sm:$0xff]  }
  0x80   :  { %1813 = vmatpush1.bf16.msra.mxu1 %v3711_v19  ;;  %1773 = vmatprep.subr.bf16.mxu0 %v3716_v20  ;;  %v3791_v19 = vld [vmem:[#allocation8 + $0x744] ss:$16 sps:$4 sm:$0xff]   ;;  %v3786_v20 = vld [vmem:[#allocation8 + $0x540] ss:$16 sps:$4 sm:$0xff]  }
  0x81   :  { %1814 = vmatprep.subr.bf16.mxu1 %v3719_v21  ;;  %1803 = vmatprep.mubr.bf16.mxu0 %v4440_v53  ;;  %v3789_v21 = vld [vmem:[#allocation8 + $0x740] ss:$16 sps:$4 sm:$0xff]  }
  0x82   :  { %1844 = vmatprep.mubr.bf16.mxu1 %v4444_v57 }
  0x83   :  { %1774 = vmatpush1.bf16.msra.mxu0 %v3714_v22  ;;  %v3794_v22 = vld [vmem:[#allocation8 + $0x524] ss:$16 sps:$4 sm:$0xff]  }
  0x84   :  { %1815 = vmatpush1.bf16.msra.mxu1 %v3717_v23  ;;  %1775 = vmatprep.subr.bf16.mxu0 %v3722_v24  ;;  %v3797_v23 = vld [vmem:[#allocation8 + $0x724] ss:$16 sps:$4 sm:$0xff]   ;;  %v3792_v24 = vld [vmem:[#allocation8 + $0x520] ss:$16 sps:$4 sm:$0xff]  }
  0x85   :  { %1816 = vmatprep.subr.bf16.mxu1 %v3725_v25  ;;  %v3795_v25 = vld [vmem:[#allocation8 + $0x720] ss:$16 sps:$4 sm:$0xff]  }
  0x87   :  { %1776 = vmatpush1.bf16.msra.mxu0 %v3720_v26  ;;  %v3800_v26 = vld [vmem:[#allocation8 + $0x504] ss:$16 sps:$4 sm:$0xff]  }
  0x88   :  { %1817 = vmatpush1.bf16.msra.mxu1 %v3723_v27  ;;  %1777 = vmatprep.subr.bf16.mxu0 %v3728_v28  ;;  %v3803_v27 = vld [vmem:[#allocation8 + $0x704] ss:$16 sps:$4 sm:$0xff]   ;;  %v3798_v28 = vld [vmem:[#allocation8 + $0x500] ss:$16 sps:$4 sm:$0xff]  }
  0x89   :  { %1818 = vmatprep.subr.bf16.mxu1 %v3731_v29  ;;  %v3801_v29 = vld [vmem:[#allocation8 + $0x700] ss:$16 sps:$4 sm:$0xff]  }
  0x8b   :  { %1778 = vmatpush1.bf16.msra.mxu0 %v3726_v30  ;;  %v3807_v30 = vld [vmem:[#allocation8 + $0xec] ss:$16 sps:$4 sm:$0xff]  }
  0x8c   :  { %1819 = vmatpush1.bf16.msra.mxu1 %v3729_v31  ;;  %1779 = vmatprep.subr.bf16.mxu0 %v3734_v32  ;;  %v3810_v31 = vld [vmem:[#allocation8 + $0x2ec] ss:$16 sps:$4 sm:$0xff]   ;;  %v4450_v32 = vpack.c.bf16 %v4433_v44, %v4433_v44  ;;  %v3820_v44 = vld [vmem:[#allocation8 + $0x2a8] ss:$16 sps:$4 sm:$0xff]  }
  0x8d   :  { %1820 = vmatprep.subr.bf16.mxu1 %v3737_v33  ;;  %v4454_v33 = vpack.c.bf16 %v4438_v50, %v4438_v50  ;;  %v3831_v50 = vld [vmem:[#allocation8 + $0x6c] ss:$16 sps:$4 sm:$0xff]  }
  0x8f   :  { %1780 = vmatpush1.bf16.msra.mxu0 %v3732_v34  ;;  %v3805_v34 = vld [vmem:[#allocation8 + $0xe8] ss:$16 sps:$4 sm:$0xff]  }
  0x90   :  { %1821 = vmatpush1.bf16.msra.mxu1 %v3735_v35  ;;  %1781 = vmatprep.subr.bf16.mxu0 %v3740_v36  ;;  %v3808_v35 = vld [vmem:[#allocation8 + $0x2e8] ss:$16 sps:$4 sm:$0xff]   ;;  %v3813_v36 = vld [vmem:[#allocation8 + $0xcc] ss:$16 sps:$4 sm:$0xff]  }
  0x91   :  { %1822 = vmatprep.subr.bf16.mxu1 %v3743_v37  ;;  %v3816_v37 = vld [vmem:[#allocation8 + $0x2cc] ss:$16 sps:$4 sm:$0xff]  }
  0x93   :  { %1782 = vmatpush1.bf16.msra.mxu0 %v3738_v38  ;;  %v3811_v38 = vld [vmem:[#allocation8 + $0xc8] ss:$16 sps:$4 sm:$0xff]  }
  0x94   :  { %1823 = vmatpush1.bf16.msra.mxu1 %v3741_v39  ;;  %1783 = vmatprep.subr.bf16.mxu0 %v3746_v40  ;;  %v3814_v39 = vld [vmem:[#allocation8 + $0x2c8] ss:$16 sps:$4 sm:$0xff]   ;;  %v3819_v40 = vld [vmem:[#allocation8 + $0xac] ss:$16 sps:$4 sm:$0xff]  }
  0x95   :  { %1824 = vmatprep.subr.bf16.mxu1 %v3749_v41  ;;  %v3822_v41 = vld [vmem:[#allocation8 + $0x2ac] ss:$16 sps:$4 sm:$0xff]  }
  0x97   :  { %1784 = vmatpush1.bf16.msra.mxu0 %v3744_v46  ;;  %v3828_v46 = vld [vmem:[#allocation8 + $0x28c] ss:$16 sps:$4 sm:$0xff]  }
  0x98   :  { %1825 = vmatpush1.bf16.msra.mxu1 %v3747_v47  ;;  %1785 = vmatprep.subr.bf16.mxu0 %v3752_v51  ;;  %v3823_v47 = vld [vmem:[#allocation8 + $0x88] ss:$16 sps:$4 sm:$0xff]   ;;  %v3834_v51 = vld [vmem:[#allocation8 + $0x26c] ss:$16 sps:$4 sm:$0xff]  }
  0x99   :  { %1826 = vmatprep.subr.bf16.mxu1 %v3755_v52  ;;  %v3837_v52 = vld [vmem:[#allocation8 + $0x4c] ss:$16 sps:$4 sm:$0xff]  }
  0x9b   :  { %1786 = vmatpush1.bf16.msra.mxu0 %v3750_v55  ;;  %v3835_v55 = vld [vmem:[#allocation8 + $0x48] ss:$16 sps:$4 sm:$0xff]  }
  0x9c   :  { %1827 = vmatpush1.bf16.msra.mxu1 %v3753_v56  ;;  %1787 = vmatprep.subr.bf16.mxu0 %v3758_v58  ;;  %v3838_v56 = vld [vmem:[#allocation8 + $0x248] ss:$16 sps:$4 sm:$0xff]   ;;  %v3843_v58 = vld [vmem:[#allocation8 + $0x2c] ss:$16 sps:$4 sm:$0xff]  }
  0x9d   :  { %1828 = vmatprep.subr.bf16.mxu1 %v3761_v59  ;;  %v3846_v59 = vld [vmem:[#allocation8 + $0x22c] ss:$16 sps:$4 sm:$0xff]  }
  0x9f   :  { %1788 = vmatpush2.bf16.msra.mxu0 %v3756_v60  ;;  %v3841_v60 = vld [vmem:[#allocation8 + $0x28] ss:$16 sps:$4 sm:$0xff]  }
  0xa0   :  { %1829 = vmatpush2.bf16.msra.mxu1 %v3759_v61  ;;  %1789 = vmatprep.subr.bf16.mxu0 %v3764_v63  ;;  %v3844_v61 = vld [vmem:[#allocation8 + $0x228] ss:$16 sps:$4 sm:$0xff]   ;;  %v3849_v63 = vld [vmem:[#allocation8 + $0xc] ss:$16 sps:$4 sm:$0xff]  }
  0xa1   :  { %1830 = vmatprep.subr.bf16.mxu1 %v3767_v0  ;;  %v3852_v0 = vld [vmem:[#allocation8 + $0x20c] ss:$16 sps:$4 sm:$0xff]  }
  0xa3   :  { %1790 = vmatpush2.bf16.msra.mxu0 %v3762_v1  ;;  %v3847_v1 = vld [vmem:[#allocation8 + $0x8] ss:$16 sps:$4 sm:$0xff]  }
  0xa4   :  { %1831 = vmatpush2.bf16.msra.mxu1 %v3765_v2  ;;  %1791 = vmatprep.subr.bf16.mxu0 %v3770_v4  ;;  %v3850_v2 = vld [vmem:[#allocation8 + $0x208] ss:$16 sps:$4 sm:$0xff]   ;;  %v3855_v4 = vld [vmem:[#allocation8 + $0x1ec] ss:$16 sps:$4 sm:$0xff]  }
  0xa5   :  { %1832 = vmatprep.subr.bf16.mxu1 %v3773_v5  ;;  %v3858_v5 = vld [vmem:[#allocation8 + $0x3ec] ss:$16 sps:$4 sm:$0xff]  }
  0xa7   :  { %1792 = vmatpush2.bf16.msra.mxu0 %v3768_v6  ;;  %v3853_v6 = vld [vmem:[#allocation8 + $0x1e8] ss:$16 sps:$4 sm:$0xff]  }
  0xa8   :  { %1833 = vmatpush2.bf16.msra.mxu1 %v3771_v7  ;;  %1793 = vmatprep.subr.bf16.mxu0 %v3776_v8  ;;  %v3856_v7 = vld [vmem:[#allocation8 + $0x3e8] ss:$16 sps:$4 sm:$0xff]   ;;  %v3861_v8 = vld [vmem:[#allocation8 + $0x1cc] ss:$16 sps:$4 sm:$0xff]  }
  0xa9   :  { %1834 = vmatprep.subr.bf16.mxu1 %v3779_v9  ;;  %v3864_v9 = vld [vmem:[#allocation8 + $0x3cc] ss:$16 sps:$4 sm:$0xff]  }
  0xab   :  { %1794 = vmatpush2.bf16.msra.mxu0 %v3774_v10  ;;  %v4460_v10 = vld [vmem:[#allocation8 + $0x1c8] ss:$16 sps:$4 sm:$0xff]  }
  0xac   :  { %1835 = vmatpush2.bf16.msra.mxu1 %v3777_v11  ;;  %1795 = vmatprep.subr.bf16.mxu0 %v3782_v12  ;;  %v4462_v11 = vld [vmem:[#allocation8 + $0x3c8] ss:$16 sps:$4 sm:$0xff]   ;;  %v4464_v12 = vld [vmem:[#allocation8 + $0x1ac] ss:$16 sps:$4 sm:$0xff]  }
  0xad   :  { %1836 = vmatprep.subr.bf16.mxu1 %v3785_v13  ;;  %v4466_v13 = vld [vmem:[#allocation8 + $0x3ac] ss:$16 sps:$4 sm:$0xff]  }
  0xaf   :  { %1796 = vmatpush2.bf16.msra.mxu0 %v3780_v14  ;;  %v4470_v14 = vld [vmem:[#allocation8 + $0x1a8] ss:$16 sps:$4 sm:$0xff]  }
  0xb0   :  { %1837 = vmatpush2.bf16.msra.mxu1 %v3783_v15  ;;  %1797 = vmatprep.subr.bf16.mxu0 %v3788_v18  ;;  %v4472_v15 = vld [vmem:[#allocation8 + $0x3a8] ss:$16 sps:$4 sm:$0xff]   ;;  %v4476_v18 = vld [vmem:[#allocation8 + $0x18c] ss:$16 sps:$4 sm:$0xff]  }
  0xb1   :  { %1838 = vmatprep.subr.bf16.mxu1 %v3791_v19  ;;  %v4478_v19 = vld [vmem:[#allocation8 + $0x38c] ss:$16 sps:$4 sm:$0xff]  }
  0xb3   :  { %1798 = vmatpush2.bf16.msra.mxu0 %v3786_v20  ;;  %v4480_v20 = vld [vmem:[#allocation8 + $0x188] ss:$16 sps:$4 sm:$0xff]  }
  0xb4   :  { %1839 = vmatpush2.bf16.msra.mxu1 %v3789_v21  ;;  %1799 = vmatprep.subr.bf16.mxu0 %v3794_v22  ;;  %v4482_v21 = vld [vmem:[#allocation8 + $0x388] ss:$16 sps:$4 sm:$0xff]   ;;  %v4484_v22 = vld [vmem:[#allocation8 + $0x16c] ss:$16 sps:$4 sm:$0xff]  }
  0xb5   :  { %1840 = vmatprep.subr.bf16.mxu1 %v3797_v23  ;;  %v4486_v23 = vld [vmem:[#allocation8 + $0x36c] ss:$16 sps:$4 sm:$0xff]  }
  0xb7   :  { %1800 = vmatpush2.bf16.msra.mxu0 %v3792_v24  ;;  %v4492_v24 = vld [vmem:[#allocation8 + $0x168] ss:$16 sps:$4 sm:$0xff]  }
  0xb8   :  { %1841 = vmatpush2.bf16.msra.mxu1 %v3795_v25  ;;  %1801 = vmatprep.subr.bf16.mxu0 %v3800_v26  ;;  %v4494_v25 = vld [vmem:[#allocation8 + $0x368] ss:$16 sps:$4 sm:$0xff]   ;;  %v4496_v26 = vld [vmem:[#allocation8 + $0x14c] ss:$16 sps:$4 sm:$0xff]  }
  0xb9   :  { %1842 = vmatprep.subr.bf16.mxu1 %v3803_v27  ;;  %v4498_v27 = vld [vmem:[#allocation8 + $0x34c] ss:$16 sps:$4 sm:$0xff]  }
  0xbb   :  { %1802 = vmatpush2.bf16.msra.mxu0 %v3798_v28  ;;  %v4504_v28 = vld [vmem:[#allocation8 + $0x148] ss:$16 sps:$4 sm:$0xff]  }
  0xbc   :  { %1843 = vmatpush2.bf16.msra.mxu1 %v3801_v29  ;;  %1853 = vmatprep.subr.bf16.mxu0 %v3807_v30  ;;  %v4506_v29 = vld [vmem:[#allocation8 + $0x348] ss:$16 sps:$4 sm:$0xff]   ;;  %v4508_v30 = vld [vmem:[#allocation8 + $0x12c] ss:$16 sps:$4 sm:$0xff]  }
  0xbd   :  { %1894 = vmatprep.subr.bf16.mxu1 %v3810_v31  ;;  %v4510_v31 = vld [vmem:[#allocation8 + $0x32c] ss:$16 sps:$4 sm:$0xff]  }
  0xbe   :  { %1804 = vmatmul.mubr.bf16.vlgmr.msra.gmra.mxu0 %v4450_v32 }
  0xbf   :  { %1845 = vmatmul.mubr.bf16.vlgmr.msra.gmra.mxu1 %v4454_v33  ;;  %1854 = vmatpush1.bf16.msra.mxu0 %v3805_v34  ;;  %v4516_v34 = vld [vmem:[#allocation8 + $0x128] ss:$16 sps:$4 sm:$0xff]  }
  0xc0   :  { %1895 = vmatpush1.bf16.msra.mxu1 %v3808_v35  ;;  %1855 = vmatprep.subr.bf16.mxu0 %v3813_v36  ;;  %v4518_v35 = vld [vmem:[#allocation8 + $0x328] ss:$16 sps:$4 sm:$0xff]   ;;  %v4520_v36 = vld [vmem:[#allocation8 + $0x10c] ss:$16 sps:$4 sm:$0xff]  }
  0xc1   :  { %1896 = vmatprep.subr.bf16.mxu1 %v3816_v37  ;;  %1885 = vmatprep.mubr.bf16.mxu0 %v4420_v62  ;;  %v3829_v62 = vld [vmem:[#allocation8 + $0x68] ss:$16 sps:$4 sm:$0xff]   ;;  %v4526_v37 = vld [vmem:[#allocation8 + $0x30c] ss:$16 sps:$4 sm:$0xff]  }
  0xc2   :  { %1926 = vmatprep.mubr.bf16.mxu1 %v4422_v3  ;;  %v3832_v3 = vld [vmem:[#allocation8 + $0x268] ss:$16 sps:$4 sm:$0xff]  }
  0xc3   :  { %1856 = vmatpush1.bf16.msra.mxu0 %v3811_v38  ;;  %v4528_v38 = vld [vmem:[#allocation8 + $0x108] ss:$16 sps:$4 sm:$0xff]  }
  0xc4   :  { %1897 = vmatpush1.bf16.msra.mxu1 %v3814_v39  ;;  %1857 = vmatprep.subr.bf16.mxu0 %v3819_v40  ;;  %v4530_v39 = vld [vmem:[#allocation8 + $0x308] ss:$16 sps:$4 sm:$0xff]   ;;  %v4532_v40 = vld [vmem:[#allocation8 + $0x4ec] ss:$16 sps:$4 sm:$0xff]  }
  0xc5   :  { %1898 = vmatprep.subr.bf16.mxu1 %v3822_v41  ;;  %v4534_v41 = vld [vmem:[#allocation8 + $0x6ec] ss:$16 sps:$4 sm:$0xff]  }
  0xc7   :  { %1858 = vmatpush1.bf16.msra.mxu0 %v3817_v42  ;;  %v4540_v42 = vld [vmem:[#allocation8 + $0x4e8] ss:$16 sps:$4 sm:$0xff]  }
  0xc8   :  { %1899 = vmatpush1.bf16.msra.mxu1 %v3820_v44  ;;  %1859 = vmatprep.subr.bf16.mxu0 %v3825_v45  ;;  %v4542_v44 = vld [vmem:[#allocation8 + $0x6e8] ss:$16 sps:$4 sm:$0xff]   ;;  %v4544_v45 = vld [vmem:[#allocation8 + $0x4cc] ss:$16 sps:$4 sm:$0xff]  }
  0xc9   :  { %1900 = vmatprep.subr.bf16.mxu1 %v3828_v46  ;;  %v4546_v46 = vld [vmem:[#allocation8 + $0x6cc] ss:$16 sps:$4 sm:$0xff]  }
  0xcb   :  { %1860 = vmatpush1.bf16.msra.mxu0 %v3823_v47  ;;  %v4552_v47 = vld [vmem:[#allocation8 + $0x4c8] ss:$16 sps:$4 sm:$0xff]  }
  0xcc   :  { %1901 = vmatpush1.bf16.msra.mxu1 %v3826_v48  ;;  %1861 = vmatprep.subr.bf16.mxu0 %v3831_v50  ;;  %v4554_v48 = vld [vmem:[#allocation8 + $0x6c8] ss:$16 sps:$4 sm:$0xff]   ;;  %v4558_v50 = vld [vmem:[#allocation8 + $0x4ac] ss:$16 sps:$4 sm:$0xff]  }
  0xcd   :  { %1902 = vmatprep.subr.bf16.mxu1 %v3834_v51  ;;  %v4560_v51 = vld [vmem:[#allocation8 + $0x6ac] ss:$16 sps:$4 sm:$0xff]  }
  0xcf   :  { %1862 = vmatpush1.bf16.msra.mxu0 %v3829_v62  ;;  %v4576_v62 = vld [vmem:[#allocation8 + $0x48c] ss:$16 sps:$4 sm:$0xff]  }
  0xd0   :  { %1903 = vmatpush1.bf16.msra.mxu1 %v3832_v3  ;;  %1863 = vmatprep.subr.bf16.mxu0 %v3837_v52  ;;  %v4578_v3 = vld [vmem:[#allocation8 + $0x68c] ss:$16 sps:$4 sm:$0xff]  }
  0xd1   :  { %1904 = vmatprep.subr.bf16.mxu1 %v3840_v54  ;;  %5142 = vst [vmem:[#allocation18_spill] sm:$0xff] %v4578_v3  ;;  %v4588_v52 = vld [vmem:[#allocation8 + $0x46c] ss:$16 sps:$4 sm:$0xff]  }
  0xd2   :  { %5145 = vst [vmem:[#allocation21_spill] sm:$0xff] %v4588_v52  ;;  %v4590_v54 = vld [vmem:[#allocation8 + $0x66c] ss:$16 sps:$4 sm:$0xff]  }
  0xd3   :  { %1864 = vmatpush1.bf16.msra.mxu0 %v3835_v55  ;;  %5146 = vst [vmem:[#allocation22_spill] sm:$0xff] %v4590_v54  ;;  %v4594_v55 = vld [vmem:[#allocation8 + $0x468] ss:$16 sps:$4 sm:$0xff]  }
  0xd4   :  { %1905 = vmatpush1.bf16.msra.mxu1 %v3838_v56  ;;  %1865 = vmatprep.subr.bf16.mxu0 %v3843_v58  ;;  %5147 = vst [vmem:[#allocation23_spill] sm:$0xff] %v4594_v55  ;;  %v4596_v56 = vld [vmem:[#allocation8 + $0x668] ss:$16 sps:$4 sm:$0xff]   ;;  %v4600_v58 = vld [vmem:[#allocation8 + $0x44c] ss:$16 sps:$4 sm:$0xff]  }
  0xd5   :  { %1906 = vmatprep.subr.bf16.mxu1 %v3846_v59  ;;  %5148 = vst [vmem:[#allocation24_spill] sm:$0xff] %v4596_v56  ;;  %5149 = vst [vmem:[#allocation25_spill] sm:$0xff] %v4600_v58  ;;  %v4602_v59 = vld [vmem:[#allocation8 + $0x64c] ss:$16 sps:$4 sm:$0xff]  }
  0xd6   :  { %5150 = vst [vmem:[#allocation26_spill] sm:$0xff] %v4602_v59 }
  0xd7   :  { %1866 = vmatpush1.bf16.msra.mxu0 %v3841_v60  ;;  %v4606_v60 = vld [vmem:[#allocation8 + $0x448] ss:$16 sps:$4 sm:$0xff]  }
  0xd8   :  { %1907 = vmatpush1.bf16.msra.mxu1 %v3844_v61  ;;  %1867 = vmatprep.subr.bf16.mxu0 %v3849_v63  ;;  %5151 = vst [vmem:[#allocation27_spill] sm:$0xff] %v4606_v60  ;;  %v4608_v61 = vld [vmem:[#allocation8 + $0x648] ss:$16 sps:$4 sm:$0xff]   ;;  %v4612_v63 = vld [vmem:[#allocation8 + $0x42c] ss:$16 sps:$4 sm:$0xff]  }
  0xd9   :  { %1908 = vmatprep.subr.bf16.mxu1 %v3852_v0  ;;  %5152 = vst [vmem:[#allocation28_spill] sm:$0xff] %v4608_v61  ;;  %5153 = vst [vmem:[#allocation29_spill] sm:$0xff] %v4612_v63  ;;  %v4614_v0 = vld [vmem:[#allocation8 + $0x62c] ss:$16 sps:$4 sm:$0xff]  }
  0xda   :  { %5154 = vst [vmem:[#allocation30_spill] sm:$0xff] %v4614_v0 }
  0xdb   :  { %1868 = vmatpush1.bf16.msra.mxu0 %v3847_v1  ;;  %v4618_v1 = vld [vmem:[#allocation8 + $0x428] ss:$16 sps:$4 sm:$0xff]  }
  0xdc   :  { %1909 = vmatpush1.bf16.msra.mxu1 %v3850_v2  ;;  %1869 = vmatprep.subr.bf16.mxu0 %v3855_v4  ;;  %5155 = vst [vmem:[#allocation31_spill] sm:$0xff] %v4618_v1  ;;  %v4620_v2 = vld [vmem:[#allocation8 + $0x628] ss:$16 sps:$4 sm:$0xff]   ;;  %v4624_v4 = vld [vmem:[#allocation8 + $0x40c] ss:$16 sps:$4 sm:$0xff]  }
  0xdd   :  { %1910 = vmatprep.subr.bf16.mxu1 %v3858_v5  ;;  %5156 = vst [vmem:[#allocation32_spill] sm:$0xff] %v4620_v2  ;;  %5157 = vst [vmem:[#allocation33_spill] sm:$0xff] %v4624_v4  ;;  %v4626_v5 = vld [vmem:[#allocation8 + $0x60c] ss:$16 sps:$4 sm:$0xff]  }
  0xde   :  { %5158 = vst [vmem:[#allocation34_spill] sm:$0xff] %v4626_v5 }
  0xdf   :  { %1870 = vmatpush2.bf16.msra.mxu0 %v3853_v6  ;;  %v4630_v6 = vld [vmem:[#allocation8 + $0x408] ss:$16 sps:$4 sm:$0xff]  }
  0xe0   :  { %1911 = vmatpush2.bf16.msra.mxu1 %v3856_v7  ;;  %1871 = vmatprep.subr.bf16.mxu0 %v3861_v8  ;;  %5159 = vst [vmem:[#allocation35_spill] sm:$0xff] %v4630_v6  ;;  %v4632_v7 = vld [vmem:[#allocation8 + $0x608] ss:$16 sps:$4 sm:$0xff]   ;;  %v4636_v8 = vld [vmem:[#allocation8 + $0x5ec] ss:$16 sps:$4 sm:$0xff]  }
  0xe1   :  { %1912 = vmatprep.subr.bf16.mxu1 %v3864_v9  ;;  %5160 = vst [vmem:[#allocation36_spill] sm:$0xff] %v4632_v7  ;;  %5161 = vst [vmem:[#allocation37_spill] sm:$0xff] %v4636_v8  ;;  %v4638_v9 = vld [vmem:[#allocation8 + $0x7ec] ss:$16 sps:$4 sm:$0xff]  }
  0xe2   :  { %5162 = vst [vmem:[#allocation38_spill] sm:$0xff] %v4638_v9 }
  0xe3   :  { %1872 = vmatpush2.bf16.msra.mxu0 %v4460_v10 }
  0xe4   :  { %1913 = vmatpush2.bf16.msra.mxu1 %v4462_v11  ;;  %1873 = vmatprep.subr.bf16.mxu0 %v4464_v12 }
  0xe5   :  { %1914 = vmatprep.subr.bf16.mxu1 %v4466_v13 }
  0xe7   :  { %1874 = vmatpush2.bf16.msra.mxu0 %v4470_v14 }
  0xe8   :  { %1915 = vmatpush2.bf16.msra.mxu1 %v4472_v15  ;;  %1875 = vmatprep.subr.bf16.mxu0 %v4476_v18 }
  0xe9   :  { %1916 = vmatprep.subr.bf16.mxu1 %v4478_v19 }
  0xeb   :  { %1876 = vmatpush2.bf16.msra.mxu0 %v4480_v20 }
  0xec   :  { %1917 = vmatpush2.bf16.msra.mxu1 %v4482_v21  ;;  %1877 = vmatprep.subr.bf16.mxu0 %v4484_v22 }
  0xed   :  { %1918 = vmatprep.subr.bf16.mxu1 %v4486_v23 }
  0xef   :  { %1878 = vmatpush2.bf16.msra.mxu0 %v4492_v24 }
  0xf0   :  { %1919 = vmatpush2.bf16.msra.mxu1 %v4494_v25  ;;  %1879 = vmatprep.subr.bf16.mxu0 %v4496_v26 }
  0xf1   :  { %1920 = vmatprep.subr.bf16.mxu1 %v4498_v27 }
  0xf3   :  { %1880 = vmatpush2.bf16.msra.mxu0 %v4504_v28 }
  0xf4   :  { %1921 = vmatpush2.bf16.msra.mxu1 %v4506_v29  ;;  %1881 = vmatprep.subr.bf16.mxu0 %v4508_v30 }
  0xf5   :  { %1922 = vmatprep.subr.bf16.mxu1 %v4510_v31 }
  0xf7   :  { %1882 = vmatpush2.bf16.msra.mxu0 %v4516_v34 }
  0xf8   :  { %1923 = vmatpush2.bf16.msra.mxu1 %v4518_v35  ;;  %1883 = vmatprep.subr.bf16.mxu0 %v4520_v36 }
  0xf9   :  { %1924 = vmatprep.subr.bf16.mxu1 %v4526_v37 }
  0xfb   :  { %1884 = vmatpush2.bf16.msra.mxu0 %v4528_v38 }
  0xfc   :  { %1925 = vmatpush2.bf16.msra.mxu1 %v4530_v39  ;;  %1935 = vmatprep.subr.bf16.mxu0 %v4532_v40 }
  0xfd   :  { %1976 = vmatprep.subr.bf16.mxu1 %v4534_v41 }
  0xfe   :  { %1886 = vmatmul.mubr.bf16.vlgmr.msra.gmra.mxu0 %v4426_v16  ;;  %v4570_v16 = vld [vmem:[#allocation8 + $0x4a8] ss:$16 sps:$4 sm:$0xff]  }
  0xff   :  { %1927 = vmatmul.mubr.bf16.vlgmr.msra.gmra.mxu1 %v4428_v17  ;;  %1936 = vmatpush1.bf16.msra.mxu0 %v4540_v42  ;;  %v4572_v17 = vld [vmem:[#allocation8 + $0x6a8] ss:$16 sps:$4 sm:$0xff]  }
 0x100   :  { %1977 = vmatpush1.bf16.msra.mxu1 %v4542_v44  ;;  %1937 = vmatprep.subr.bf16.mxu0 %v4544_v45 }
 0x101   :  { %1978 = vmatprep.subr.bf16.mxu1 %v4546_v46  ;;  %1967 = vmatprep.mubr.bf16.mxu0 %v4440_v53  ;;  %v4582_v53 = vld [vmem:[#allocation8 + $0x488] ss:$16 sps:$4 sm:$0xff]  }
 0x102   :  { %2008 = vmatprep.mubr.bf16.mxu1 %v4444_v57  ;;  %5143 = vst [vmem:[#allocation19_spill] sm:$0xff] %v4582_v53  ;;  %v4584_v57 = vld [vmem:[#allocation8 + $0x688] ss:$16 sps:$4 sm:$0xff]  }
 0x103   :  { %1938 = vmatpush1.bf16.msra.mxu0 %v4552_v47  ;;  %5144 = vst [vmem:[#allocation20_spill] sm:$0xff] %v4584_v57 }
 0x104   :  { %1979 = vmatpush1.bf16.msra.mxu1 %v4554_v48  ;;  %1939 = vmatprep.subr.bf16.mxu0 %v4558_v50 }
 0x105   :  { %1980 = vmatprep.subr.bf16.mxu1 %v4560_v51 }
 0x107   :  { %1940 = vmatpush1.bf16.msra.mxu0 %v4570_v16 }
 0x108   :  { %1981 = vmatpush1.bf16.msra.mxu1 %v4572_v17  ;;  %1941 = vmatprep.subr.bf16.mxu0 %v4576_v62 }
 0x109   :  { %1982 = vmatprep.subr.bf16.mxu1 %v4578_v3  ;;  %v4115_v3 = vld [vmem:[#allocation8 + $0x4a4] ss:$16 sps:$4 sm:$0xff]  }
 0x10b   :  { %1942 = vmatpush1.bf16.msra.mxu0 %v4582_v53 }
 0x10c   :  { %1983 = vmatpush1.bf16.msra.mxu1 %v4584_v57  ;;  %1943 = vmatprep.subr.bf16.mxu0 %v4588_v52  ;;  %v4111_v52 = vld [vmem:[#allocation8 + $0x4c4] ss:$16 sps:$4 sm:$0xff]  }
 0x10d   :  { %1984 = vmatprep.subr.bf16.mxu1 %v4590_v54 }
 0x10f   :  { %1944 = vmatpush1.bf16.msra.mxu0 %v4594_v55 }
 0x110   :  { %1985 = vmatpush1.bf16.msra.mxu1 %v4596_v56  ;;  %1945 = vmatprep.subr.bf16.mxu0 %v4600_v58  ;;  %v4047_v58 = vld [vmem:[#allocation8 + $0xc4] ss:$16 sps:$4 sm:$0xff]  }
 0x111   :  { %1986 = vmatprep.subr.bf16.mxu1 %v4602_v59  ;;  %v4045_v59 = vld [vmem:[#allocation8 + $0xe0] ss:$16 sps:$4 sm:$0xff]   ;;  %v4052_v56 = vld [vmem:[#allocation8 + $0x2a4] ss:$16 sps:$4 sm:$0xff]  }
 0x113   :  { %1946 = vmatpush1.bf16.msra.mxu0 %v4606_v60 }
 0x114   :  { %1987 = vmatpush1.bf16.msra.mxu1 %v4608_v61  ;;  %1947 = vmatprep.subr.bf16.mxu0 %v4612_v63 }
 0x115   :  { %1988 = vmatprep.subr.bf16.mxu1 %v4614_v0 }
 0x117   :  { %1948 = vmatpush1.bf16.msra.mxu0 %v4618_v1  ;;  %v4644_v1 = vld [vmem:[#allocation8 + $0x7e8] ss:$16 sps:$4 sm:$0xff]  }
 0x118   :  { %1989 = vmatpush1.bf16.msra.mxu1 %v4620_v2  ;;  %1949 = vmatprep.subr.bf16.mxu0 %v4624_v4  ;;  %5164 = vst [vmem:[#allocation40_spill] sm:$0xff] %v4644_v1  ;;  %v4648_v2 = vld [vmem:[#allocation8 + $0x5cc] ss:$16 sps:$4 sm:$0xff]  }
 0x119   :  { %1990 = vmatprep.subr.bf16.mxu1 %v4626_v5  ;;  %5165 = vst [vmem:[#allocation41_spill] sm:$0xff] %v4648_v2  ;;  %v4650_v4 = vld [vmem:[#allocation8 + $0x7cc] ss:$16 sps:$4 sm:$0xff]   ;;  %v4654_v5 = vld [vmem:[#allocation8 + $0x5c8] ss:$16 sps:$4 sm:$0xff]  }
 0x11a   :  { %5166 = vst [vmem:[#allocation42_spill] sm:$0xff] %v4650_v4  ;;  %5167 = vst [vmem:[#allocation43_spill] sm:$0xff] %v4654_v5 }
 0x11b   :  { %1950 = vmatpush1.bf16.msra.mxu0 %v4630_v6  ;;  %v4656_v6 = vld [vmem:[#allocation8 + $0x7c8] ss:$16 sps:$4 sm:$0xff]  }
 0x11c   :  { %1991 = vmatpush1.bf16.msra.mxu1 %v4632_v7  ;;  %1951 = vmatprep.subr.bf16.mxu0 %v4636_v8  ;;  %5168 = vst [vmem:[#allocation44_spill] sm:$0xff] %v4656_v6  ;;  %v4660_v7 = vld [vmem:[#allocation8 + $0x5ac] ss:$16 sps:$4 sm:$0xff]  }
 0x11d   :  { %1992 = vmatprep.subr.bf16.mxu1 %v4638_v9  ;;  %5169 = vst [vmem:[#allocation45_spill] sm:$0xff] %v4660_v7  ;;  %v4662_v8 = vld [vmem:[#allocation8 + $0x7ac] ss:$16 sps:$4 sm:$0xff]   ;;  %v4666_v9 = vld [vmem:[#allocation8 + $0x5a8] ss:$16 sps:$4 sm:$0xff]  }
 0x11e   :  { %5170 = vst [vmem:[#allocation46_spill] sm:$0xff] %v4662_v8  ;;  %5171 = vst [vmem:[#allocation47_spill] sm:$0xff] %v4666_v9 }
 0x11f   :  { %1952 = vmatpush2.bf16.msra.mxu0 %v4642_v43  ;;  %v4668_v43 = vld [vmem:[#allocation8 + $0x7a8] ss:$16 sps:$4 sm:$0xff]  }
 0x120   :  { %1993 = vmatpush2.bf16.msra.mxu1 %v4644_v1  ;;  %1953 = vmatprep.subr.bf16.mxu0 %v4648_v2  ;;  %5172 = vst [vmem:[#allocation48_spill] sm:$0xff] %v4668_v43  ;;  %v4672_v1 = vld [vmem:[#allocation8 + $0x58c] ss:$16 sps:$4 sm:$0xff]  }
 0x121   :  { %1994 = vmatprep.subr.bf16.mxu1 %v4650_v4  ;;  %5173 = vst [vmem:[#allocation49_spill] sm:$0xff] %v4672_v1  ;;  %v4674_v2 = vld [vmem:[#allocation8 + $0x78c] ss:$16 sps:$4 sm:$0xff]   ;;  %v4678_v4 = vld [vmem:[#allocation8 + $0x588] ss:$16 sps:$4 sm:$0xff]  }
 0x122   :  { %5174 = vst [vmem:[#allocation50_spill] sm:$0xff] %v4674_v2  ;;  %5175 = vst [vmem:[#allocation51_spill] sm:$0xff] %v4678_v4 }
 0x123   :  { %1954 = vmatpush2.bf16.msra.mxu0 %v4654_v5  ;;  %v4680_v5 = vld [vmem:[#allocation8 + $0x788] ss:$16 sps:$4 sm:$0xff]  }
 0x124   :  { %1995 = vmatpush2.bf16.msra.mxu1 %v4656_v6  ;;  %1955 = vmatprep.subr.bf16.mxu0 %v4660_v7  ;;  %5176 = vst [vmem:[#allocation52_spill] sm:$0xff] %v4680_v5  ;;  %v4684_v6 = vld [vmem:[#allocation8 + $0x56c] ss:$16 sps:$4 sm:$0xff]  }
 0x125   :  { %1996 = vmatprep.subr.bf16.mxu1 %v4662_v8  ;;  %5177 = vst [vmem:[#allocation53_spill] sm:$0xff] %v4684_v6  ;;  %v4686_v7 = vld [vmem:[#allocation8 + $0x76c] ss:$16 sps:$4 sm:$0xff]   ;;  %v4690_v8 = vld [vmem:[#allocation8 + $0x568] ss:$16 sps:$4 sm:$0xff]  }
 0x126   :  { %5178 = vst [vmem:[#allocation54_spill] sm:$0xff] %v4686_v7  ;;  %5179 = vst [vmem:[#allocation55_spill] sm:$0xff] %v4690_v8 }
 0x127   :  { %1956 = vmatpush2.bf16.msra.mxu0 %v4666_v9  ;;  %v4692_v9 = vld [vmem:[#allocation8 + $0x768] ss:$16 sps:$4 sm:$0xff]  }
 0x128   :  { %1997 = vmatpush2.bf16.msra.mxu1 %v4668_v43  ;;  %1957 = vmatprep.subr.bf16.mxu0 %v4672_v1  ;;  %5180 = vst [vmem:[#allocation56_spill] sm:$0xff] %v4692_v9  ;;  %v4696_v43 = vld [vmem:[#allocation8 + $0x54c] ss:$16 sps:$4 sm:$0xff]  }
 0x129   :  { %1998 = vmatprep.subr.bf16.mxu1 %v4674_v2  ;;  %5181 = vst [vmem:[#allocation57_spill] sm:$0xff] %v4696_v43  ;;  %v4698_v1 = vld [vmem:[#allocation8 + $0x74c] ss:$16 sps:$4 sm:$0xff]   ;;  %v2043_v2 = vld [vmem:[#allocation6] sm:$0xff] }
 0x12a   :  { %5182 = vst [vmem:[#allocation58_spill] sm:$0xff] %v4698_v1  ;;  %v2047_v0 = vcombine.high %v2043_v2, %v2043_v2  ;;  %v4725_v63 = vrot.slane %v2043_v2, %v4416_v49 }
 0x12b   :  { %1958 = vmatpush2.bf16.msra.mxu0 %v4678_v4  ;;  %v4702_v4 = vld [vmem:[#allocation8 + $0x548] ss:$16 sps:$4 sm:$0xff]  }
 0x12c   :  { %1999 = vmatpush2.bf16.msra.mxu1 %v4680_v5  ;;  %1959 = vmatprep.subr.bf16.mxu0 %v4684_v6  ;;  %5183 = vst [vmem:[#allocation59_spill] sm:$0xff] %v4702_v4  ;;  %v4704_v5 = vld [vmem:[#allocation8 + $0x748] ss:$16 sps:$4 sm:$0xff]   ;;  %v4708_v6 = vld [vmem:[#allocation8 + $0x52c] ss:$16 sps:$4 sm:$0xff]   ;;  %v4728_v61 = vrot.slane %v2047_v0, %v4416_v49 }
 0x12d   :  { %2000 = vmatprep.subr.bf16.mxu1 %v4686_v7  ;;  %5184 = vst [vmem:[#allocation60_spill] sm:$0xff] %v4704_v5  ;;  %5185 = vst [vmem:[#allocation61_spill] sm:$0xff] %v4708_v6  ;;  %v4710_v7 = vld [vmem:[#allocation8 + $0x72c] ss:$16 sps:$4 sm:$0xff]   ;;  %v4043_v0 = vld [vmem:[#allocation8 + $0xe4] ss:$16 sps:$4 sm:$0xff]  }
 0x12e   :  { %5186 = vst [vmem:[#allocation62_spill] sm:$0xff] %v4710_v7  ;;  %v2063_v2 = vcombine.high %v4728_v61, %v4728_v61 }
 0x12f   :  { %1960 = vmatpush2.bf16.msra.mxu0 %v4690_v8  ;;  %v4714_v8 = vld [vmem:[#allocation8 + $0x528] ss:$16 sps:$4 sm:$0xff]  }
 0x130   :  { %2001 = vmatpush2.bf16.msra.mxu1 %v4692_v9  ;;  %1961 = vmatprep.subr.bf16.mxu0 %v4696_v43  ;;  %5187 = vst [vmem:[#allocation63_spill] sm:$0xff] %v4714_v8  ;;  %v4716_v9 = vld [vmem:[#allocation8 + $0x728] ss:$16 sps:$4 sm:$0xff]   ;;  %v4720_v43 = vld [vmem:[#allocation8 + $0x50c] ss:$16 sps:$4 sm:$0xff]  }
 0x131   :  { %2002 = vmatprep.subr.bf16.mxu1 %v4698_v1  ;;  %5188 = vst [vmem:[#allocation64_spill] sm:$0xff] %v4716_v9  ;;  %5189 = vst [vmem:[#allocation65_spill] sm:$0xff] %v4720_v43  ;;  %v4722_v1 = vld [vmem:[#allocation8 + $0x70c] ss:$16 sps:$4 sm:$0xff]  }
 0x132   :  { %5190 = vst [vmem:[#allocation66_spill] sm:$0xff] %v4722_v1 }
 0x133   :  { %1962 = vmatpush2.bf16.msra.mxu0 %v4702_v4  ;;  %v4734_v4 = vld [vmem:[#allocation8 + $0x708] ss:$16 sps:$4 sm:$0xff]  }
 0x134   :  { %2003 = vmatpush2.bf16.msra.mxu1 %v4704_v5  ;;  %1963 = vmatprep.subr.bf16.mxu0 %v4708_v6  ;;  %v4732_v5 = vld [vmem:[#allocation8 + $0x508] ss:$16 sps:$4 sm:$0xff]   ;;  %5192 = vst [vmem:[#allocation68_spill] sm:$0xff] %v4734_v4  ;;  %v4746_v6 = vpack.c.bf16 %v2063_v2, %v2063_v2  ;;  %v4051_v2 = vld [vmem:[#allocation8 + $0xa4] ss:$16 sps:$4 sm:$0xff]  }
 0x135   :  { %2004 = vmatprep.subr.bf16.mxu1 %v4710_v7  ;;  %5191 = vst [vmem:[#allocation67_spill] sm:$0xff] %v4732_v5  ;;  %v2062_v7 = vcombine.high %v4725_v63, %v4725_v63 }
 0x137   :  { %1964 = vmatpush2.bf16.msra.mxu0 %v4714_v8  ;;  %v4744_v8 = vpack.c.bf16 %v2062_v7, %v2062_v7  ;;  %v4048_v7 = vld [vmem:[#allocation8 + $0x2c4] ss:$16 sps:$4 sm:$0xff]  }
 0x138   :  { %2005 = vmatpush2.bf16.msra.mxu1 %v4716_v9  ;;  %1965 = vmatprep.subr.bf16.mxu0 %v4720_v43  ;;  %v4044_v9 = vld [vmem:[#allocation8 + $0x2e4] ss:$16 sps:$4 sm:$0xff]  }
 0x139   :  { %2006 = vmatprep.subr.bf16.mxu1 %v4722_v1 }
 0x13b   :  { %1966 = vmatpush2.bf16.msra.mxu0 %v4732_v5  ;;  %v4046_v5 = vld [vmem:[#allocation8 + $0x2e0] ss:$16 sps:$4 sm:$0xff]  }
 0x13c   :  { %2007 = vmatpush2.bf16.msra.mxu1 %v4734_v4  ;;  %2097 = vmatprep.subr.bf16.mxu0 %v4043_v0 }
 0x13d   :  { %2138 = vmatprep.subr.bf16.mxu1 %v4044_v9 }
 0x13e   :  { %v1723_v43 = vpop.f32.mrf.mxu0  ;;  %1968 = vmatmul.mubr.bf16.vlgmr.msra.gmra.mxu0 %v4450_v32 }
 0x13f   :  { %v1764_v1 = vpop.f32.mrf.mxu1  ;;  %2009 = vmatmul.mubr.bf16.vlgmr.msra.gmra.mxu1 %v4454_v33  ;;  %2098 = vmatpush1.bf16.msra.mxu0 %v4045_v59 }
 0x140   :  { %v4750_v60 = vadd.f32 %v1764_v1, %v1723_v43  ;;  %2139 = vmatpush1.bf16.msra.mxu1 %v4046_v5  ;;  %v1725_v4 = vpop.f32.mrf.mxu0  ;;  %2099 = vmatprep.subr.bf16.mxu0 %v4047_v58  ;;  %v4049_v43 = vld [vmem:[#allocation8 + $0xc0] ss:$16 sps:$4 sm:$0xff]  }
 0x141   :  { %v1766_v0 = vpop.f32.mrf.mxu1  ;;  %2140 = vmatprep.subr.bf16.mxu1 %v4048_v7  ;;  %2129 = vmatprep.mubr.bf16.mxu0 %v4744_v8  ;;  %v4050_v1 = vld [vmem:[#allocation8 + $0x2c0] ss:$16 sps:$4 sm:$0xff]   ;;  %v4056_v7 = vld [vmem:[#allocation8 + $0x284] ss:$16 sps:$4 sm:$0xff]  }
 0x142   :  { %v4752_v9 = vadd.f32 %v1766_v0, %v1725_v4  ;;  %2170 = vmatprep.mubr.bf16.mxu1 %v4746_v6  ;;  %v1727_v32 = vpop.f32.mrf.mxu0  ;;  %v4053_v58 = vld [vmem:[#allocation8 + $0xa0] ss:$16 sps:$4 sm:$0xff]   ;;  %v4055_v0 = vld [vmem:[#allocation8 + $0x84] ss:$16 sps:$4 sm:$0xff]  }
 0x143   :  { %v1768_v33 = vpop.f32.mrf.mxu1  ;;  %2100 = vmatpush1.bf16.msra.mxu0 %v4049_v43  ;;  %v4054_v4 = vld [vmem:[#allocation8 + $0x2a0] ss:$16 sps:$4 sm:$0xff]   ;;  %v4059_v43 = vld [vmem:[#allocation8 + $0x64] ss:$16 sps:$4 sm:$0xff]  }
 0x144   :  { %2141 = vmatpush1.bf16.msra.mxu1 %v4050_v1  ;;  %v1728_v59 = vpop.f32.mrf.mxu0  ;;  %2101 = vmatprep.subr.bf16.mxu0 %v4051_v2  ;;  %v4057_v32 = vld [vmem:[#allocation8 + $0x80] ss:$16 sps:$4 sm:$0xff]   ;;  %v4060_v1 = vld [vmem:[#allocation8 + $0x264] ss:$16 sps:$4 sm:$0xff]  }
 0x145   :  { %v1769_v5 = vpop.f32.mrf.mxu1  ;;  %2142 = vmatprep.subr.bf16.mxu1 %v4052_v56  ;;  %v4058_v33 = vld [vmem:[#allocation8 + $0x280] ss:$16 sps:$4 sm:$0xff]   ;;  %v4063_v56 = vld [vmem:[#allocation8 + $0x44] ss:$16 sps:$4 sm:$0xff]  }
 0x146   :  { %v4061_v59 = vld [vmem:[#allocation8 + $0x60] ss:$16 sps:$4 sm:$0xff]   ;;  %v4064_v2 = vld [vmem:[#allocation8 + $0x244] ss:$16 sps:$4 sm:$0xff]  }
 0x147   :  { %2102 = vmatpush1.bf16.msra.mxu0 %v4053_v58  ;;  %v4062_v5 = vld [vmem:[#allocation8 + $0x260] ss:$16 sps:$4 sm:$0xff]  }
 0x148   :  { %2143 = vmatpush1.bf16.msra.mxu1 %v4054_v4  ;;  %2103 = vmatprep.subr.bf16.mxu0 %v4055_v0  ;;  %v4065_v58 = vld [vmem:[#allocation8 + $0x40] ss:$16 sps:$4 sm:$0xff]   ;;  %v4067_v0 = vld [vmem:[#allocation8 + $0x24] ss:$16 sps:$4 sm:$0xff]  }
 0x149   :  { %2144 = vmatprep.subr.bf16.mxu1 %v4056_v7  ;;  %v4066_v4 = vld [vmem:[#allocation8 + $0x240] ss:$16 sps:$4 sm:$0xff]   ;;  %v4068_v7 = vld [vmem:[#allocation8 + $0x224] ss:$16 sps:$4 sm:$0xff]  }
 0x14b   :  { %2104 = vmatpush1.bf16.msra.mxu0 %v4057_v32  ;;  %v4069_v32 = vld [vmem:[#allocation8 + $0x20] ss:$16 sps:$4 sm:$0xff]  }
 0x14c   :  { %2145 = vmatpush1.bf16.msra.mxu1 %v4058_v33  ;;  %2105 = vmatprep.subr.bf16.mxu0 %v4059_v43  ;;  %v4070_v33 = vld [vmem:[#allocation8 + $0x220] ss:$16 sps:$4 sm:$0xff]   ;;  %v4071_v43 = vld [vmem:[#allocation8 + $0x4] ss:$16 sps:$4 sm:$0xff]  }
 0x14d   :  { %2146 = vmatprep.subr.bf16.mxu1 %v4060_v1  ;;  %v4072_v1 = vld [vmem:[#allocation8 + $0x204] ss:$16 sps:$4 sm:$0xff]  }
 0x14f   :  { %2106 = vmatpush1.bf16.msra.mxu0 %v4061_v59  ;;  %v4073_v59 = vld [vmem:[#allocation8] ss:$16 sps:$4 sm:$0xff]  }
 0x150   :  { %2147 = vmatpush1.bf16.msra.mxu1 %v4062_v5  ;;  %2107 = vmatprep.subr.bf16.mxu0 %v4063_v56  ;;  %v4074_v5 = vld [vmem:[#allocation8 + $0x200] ss:$16 sps:$4 sm:$0xff]   ;;  %v4075_v56 = vld [vmem:[#allocation8 + $0x1e4] ss:$16 sps:$4 sm:$0xff]  }
 0x151   :  { %2148 = vmatprep.subr.bf16.mxu1 %v4064_v2  ;;  %v4076_v2 = vld [vmem:[#allocation8 + $0x3e4] ss:$16 sps:$4 sm:$0xff]  }
 0x153   :  { %2108 = vmatpush1.bf16.msra.mxu0 %v4065_v58  ;;  %v4077_v58 = vld [vmem:[#allocation8 + $0x1e0] ss:$16 sps:$4 sm:$0xff]  }
 0x154   :  { %2149 = vmatpush1.bf16.msra.mxu1 %v4066_v4  ;;  %2109 = vmatprep.subr.bf16.mxu0 %v4067_v0  ;;  %v4078_v4 = vld [vmem:[#allocation8 + $0x3e0] ss:$16 sps:$4 sm:$0xff]   ;;  %v4079_v0 = vld [vmem:[#allocation8 + $0x1c4] ss:$16 sps:$4 sm:$0xff]  }
 0x155   :  { %2150 = vmatprep.subr.bf16.mxu1 %v4068_v7  ;;  %v4080_v7 = vld [vmem:[#allocation8 + $0x3c4] ss:$16 sps:$4 sm:$0xff]  }
 0x157   :  { %2110 = vmatpush1.bf16.msra.mxu0 %v4069_v32  ;;  %v4081_v32 = vld [vmem:[#allocation8 + $0x1c0] ss:$16 sps:$4 sm:$0xff]  }
 0x158   :  { %2151 = vmatpush1.bf16.msra.mxu1 %v4070_v33  ;;  %2111 = vmatprep.subr.bf16.mxu0 %v4071_v43  ;;  %v4082_v33 = vld [vmem:[#allocation8 + $0x3c0] ss:$16 sps:$4 sm:$0xff]   ;;  %v4083_v43 = vld [vmem:[#allocation8 + $0x1a4] ss:$16 sps:$4 sm:$0xff]  }
 0x159   :  { %2152 = vmatprep.subr.bf16.mxu1 %v4072_v1  ;;  %v4084_v1 = vld [vmem:[#allocation8 + $0x3a4] ss:$16 sps:$4 sm:$0xff]  }
 0x15b   :  { %2112 = vmatpush1.bf16.msra.mxu0 %v4073_v59  ;;  %v4085_v59 = vld [vmem:[#allocation8 + $0x1a0] ss:$16 sps:$4 sm:$0xff]  }
 0x15c   :  { %2153 = vmatpush1.bf16.msra.mxu1 %v4074_v5  ;;  %2113 = vmatprep.subr.bf16.mxu0 %v4075_v56  ;;  %v4086_v5 = vld [vmem:[#allocation8 + $0x3a0] ss:$16 sps:$4 sm:$0xff]   ;;  %v4087_v56 = vld [vmem:[#allocation8 + $0x184] ss:$16 sps:$4 sm:$0xff]  }
 0x15d   :  { %2154 = vmatprep.subr.bf16.mxu1 %v4076_v2  ;;  %v4088_v2 = vld [vmem:[#allocation8 + $0x384] ss:$16 sps:$4 sm:$0xff]  }
 0x15f   :  { %2114 = vmatpush2.bf16.msra.mxu0 %v4077_v58  ;;  %v4089_v58 = vld [vmem:[#allocation8 + $0x180] ss:$16 sps:$4 sm:$0xff]  }
 0x160   :  { %2155 = vmatpush2.bf16.msra.mxu1 %v4078_v4  ;;  %2115 = vmatprep.subr.bf16.mxu0 %v4079_v0  ;;  %v4090_v4 = vld [vmem:[#allocation8 + $0x380] ss:$16 sps:$4 sm:$0xff]   ;;  %v4091_v0 = vld [vmem:[#allocation8 + $0x164] ss:$16 sps:$4 sm:$0xff]  }
 0x161   :  { %2156 = vmatprep.subr.bf16.mxu1 %v4080_v7  ;;  %v4092_v7 = vld [vmem:[#allocation8 + $0x364] ss:$16 sps:$4 sm:$0xff]  }
 0x163   :  { %2116 = vmatpush2.bf16.msra.mxu0 %v4081_v32  ;;  %v2044_v32 = vld [vmem:[#allocation6 + $0x8] sm:$0xff] }
 0x164   :  { %2157 = vmatpush2.bf16.msra.mxu1 %v4082_v33  ;;  %2117 = vmatprep.subr.bf16.mxu0 %v4083_v43  ;;  %v4093_v33 = vld [vmem:[#allocation8 + $0x160] ss:$16 sps:$4 sm:$0xff]  }
 0x165   :  { %2158 = vmatprep.subr.bf16.mxu1 %v4084_v1  ;;  %v4094_v43 = vld [vmem:[#allocation8 + $0x360] ss:$16 sps:$4 sm:$0xff]   ;;  %v4095_v1 = vld [vmem:[#allocation8 + $0x144] ss:$16 sps:$4 sm:$0xff]  }
 0x167   :  { %2118 = vmatpush2.bf16.msra.mxu0 %v4085_v59  ;;  %v4096_v59 = vld [vmem:[#allocation8 + $0x344] ss:$16 sps:$4 sm:$0xff]  }
 0x168   :  { %2159 = vmatpush2.bf16.msra.mxu1 %v4086_v5  ;;  %2119 = vmatprep.subr.bf16.mxu0 %v4087_v56  ;;  %v2064_v5 = vcombine.high %v2044_v32, %v2044_v32  ;;  %v4097_v56 = vld [vmem:[#allocation8 + $0x140] ss:$16 sps:$4 sm:$0xff]  }
 0x169   :  { %2160 = vmatprep.subr.bf16.mxu1 %v4088_v2  ;;  %v4098_v2 = vld [vmem:[#allocation8 + $0x340] ss:$16 sps:$4 sm:$0xff]  }
 0x16b   :  { %2120 = vmatpush2.bf16.msra.mxu0 %v4089_v58  ;;  %v4099_v58 = vld [vmem:[#allocation8 + $0x124] ss:$16 sps:$4 sm:$0xff]  }
 0x16c   :  { %2161 = vmatpush2.bf16.msra.mxu1 %v4090_v4  ;;  %2121 = vmatprep.subr.bf16.mxu0 %v4091_v0  ;;  %v4100_v4 = vld [vmem:[#allocation8 + $0x324] ss:$16 sps:$4 sm:$0xff]   ;;  %v4757_v0 = vrot.slane %v2044_v32, %v4416_v49  ;;  %v4768_v32 = vpack.c.bf16 %v4725_v63, %v4725_v63  ;;  %v4109_v63 = vld [vmem:[#allocation8 + $0x4e0] ss:$16 sps:$4 sm:$0xff]  }
 0x16d   :  { %2162 = vmatprep.subr.bf16.mxu1 %v4092_v7  ;;  %v4760_v7 = vrot.slane %v2064_v5, %v4416_v49  ;;  %v4772_v5 = vpack.c.bf16 %v4728_v61, %v4728_v61 }
 0x16f   :  { %2122 = vmatpush2.bf16.msra.mxu0 %v4093_v33  ;;  %v4101_v33 = vld [vmem:[#allocation8 + $0x120] ss:$16 sps:$4 sm:$0xff]  }
 0x170   :  { %2163 = vmatpush2.bf16.msra.mxu1 %v4094_v43  ;;  %2123 = vmatprep.subr.bf16.mxu0 %v4095_v1  ;;  %v4102_v43 = vld [vmem:[#allocation8 + $0x320] ss:$16 sps:$4 sm:$0xff]   ;;  %v4103_v1 = vld [vmem:[#allocation8 + $0x104] ss:$16 sps:$4 sm:$0xff]  }
 0x171   :  { %2164 = vmatprep.subr.bf16.mxu1 %v4096_v59  ;;  %v4104_v59 = vld [vmem:[#allocation8 + $0x304] ss:$16 sps:$4 sm:$0xff]  }
 0x173   :  { %2124 = vmatpush2.bf16.msra.mxu0 %v4097_v56  ;;  %v2079_v56 = vcombine.high %v4757_v0, %v4757_v0 }
 0x174   :  { %2165 = vmatpush2.bf16.msra.mxu1 %v4098_v2  ;;  %2125 = vmatprep.subr.bf16.mxu0 %v4099_v58  ;;  %v2080_v2 = vcombine.high %v4760_v7, %v4760_v7  ;;  %v4105_v58 = vld [vmem:[#allocation8 + $0x100] ss:$16 sps:$4 sm:$0xff]  }
 0x175   :  { %2166 = vmatprep.subr.bf16.mxu1 %v4100_v4  ;;  %v4106_v4 = vld [vmem:[#allocation8 + $0x300] ss:$16 sps:$4 sm:$0xff]  }
 0x177   :  { %2126 = vmatpush2.bf16.msra.mxu0 %v4101_v33  ;;  %v4107_v33 = vld [vmem:[#allocation8 + $0x4e4] ss:$16 sps:$4 sm:$0xff]  }
 0x178   :  { %2167 = vmatpush2.bf16.msra.mxu1 %v4102_v43  ;;  %2127 = vmatprep.subr.bf16.mxu0 %v4103_v1  ;;  %v4108_v43 = vld [vmem:[#allocation8 + $0x6e4] ss:$16 sps:$4 sm:$0xff]   ;;  %v4774_v1 = vpack.c.bf16 %v2079_v56, %v2079_v56 }
 0x179   :  { %2168 = vmatprep.subr.bf16.mxu1 %v4104_v59  ;;  %v4776_v59 = vpack.c.bf16 %v2080_v2, %v2080_v2  ;;  %v4112_v56 = vld [vmem:[#allocation8 + $0x6c4] ss:$16 sps:$4 sm:$0xff]  }
 0x17b   :  { %2128 = vmatpush2.bf16.msra.mxu0 %v4105_v58  ;;  %v4110_v58 = vld [vmem:[#allocation8 + $0x6e0] ss:$16 sps:$4 sm:$0xff]  }
 0x17c   :  { %2169 = vmatpush2.bf16.msra.mxu1 %v4106_v4  ;;  %2179 = vmatprep.subr.bf16.mxu0 %v4107_v33 }
 0x17d   :  { %2220 = vmatprep.subr.bf16.mxu1 %v4108_v43 }
 0x17e   :  { %v1805_v55 = vpop.f32.mrf.mxu0  ;;  %2130 = vmatmul.mubr.bf16.vlgmr.msra.gmra.mxu0 %v4768_v32 }
 0x17f   :  { %v1846_v54 = vpop.f32.mrf.mxu1  ;;  %2171 = vmatmul.mubr.bf16.vlgmr.msra.gmra.mxu1 %v4772_v5  ;;  %v1806_v61 = vadd.f32 %v1805_v55, %v4750_v60  ;;  %2180 = vmatpush1.bf16.msra.mxu0 %v4109_v63  ;;  %v4113_v63 = vld [vmem:[#allocation8 + $0x4c0] ss:$16 sps:$4 sm:$0xff]  }
 0x180   :  { %2221 = vmatpush1.bf16.msra.mxu1 %v4110_v58  ;;  %v1807_v4 = vpop.f32.mrf.mxu0  ;;  %2181 = vmatprep.subr.bf16.mxu0 %v4111_v52  ;;  %v4114_v58 = vld [vmem:[#allocation8 + $0x6c0] ss:$16 sps:$4 sm:$0xff]  }
 0x181   :  { %v1848_v33 = vpop.f32.mrf.mxu1  ;;  %2222 = vmatprep.subr.bf16.mxu1 %v4112_v56  ;;  %v4781_v2 = vadd.f32 %v1846_v54, %v1806_v61  ;;  %v1808_v43 = vadd.f32 %v1807_v4, %v4752_v9  ;;  %2211 = vmatprep.mubr.bf16.mxu0 %v4774_v1  ;;  %v4116_v54 = vld [vmem:[#allocation8 + $0x6a4] ss:$16 sps:$4 sm:$0xff]   ;;  %v4117_v61 = vld [vmem:[#allocation8 + $0x4a0] ss:$16 sps:$4 sm:$0xff]   ;;  %v4180_v9 = vld [vmem:[#allocation8 + $0x2ac] ss:$16 sps:$4 sm:$0xff]  }
 0x182   :  { %2252 = vmatprep.mubr.bf16.mxu1 %v4776_v59  ;;  %v1809_v57 = vpop.f32.mrf.mxu0  ;;  %v4118_v4 = vld [vmem:[#allocation8 + $0x6a0] ss:$16 sps:$4 sm:$0xff]  }
 0x183   :  { %v1850_v55 = vpop.f32.mrf.mxu1  ;;  %v4786_v60 = vadd.f32 %v1848_v33, %v1808_v43  ;;  %2182 = vmatpush1.bf16.msra.mxu0 %v4113_v63  ;;  %v4119_v57 = vld [vmem:[#allocation8 + $0x484] ss:$16 sps:$4 sm:$0xff]   ;;  %v4121_v56 = vld [vmem:[#allocation8 + $0x480] ss:$16 sps:$4 sm:$0xff]  }
 0x184   :  { %2223 = vmatpush1.bf16.msra.mxu1 %v4114_v58  ;;  %v1810_v53 = vpop.f32.mrf.mxu0  ;;  %2183 = vmatprep.subr.bf16.mxu0 %v4115_v3  ;;  %v4120_v33 = vld [vmem:[#allocation8 + $0x684] ss:$16 sps:$4 sm:$0xff]   ;;  %v4122_v43 = vld [vmem:[#allocation8 + $0x680] ss:$16 sps:$4 sm:$0xff]  }
 0x185   :  { %v1851_v52 = vpop.f32.mrf.mxu1  ;;  %2224 = vmatprep.subr.bf16.mxu1 %v4116_v54  ;;  %v4123_v53 = vld [vmem:[#allocation8 + $0x464] ss:$16 sps:$4 sm:$0xff]   ;;  %v4125_v55 = vld [vmem:[#allocation8 + $0x460] ss:$16 sps:$4 sm:$0xff]  }
 0x186   :  { %v4124_v3 = vld [vmem:[#allocation8 + $0x664] ss:$16 sps:$4 sm:$0xff]   ;;  %v4126_v63 = vld [vmem:[#allocation8 + $0x660] ss:$16 sps:$4 sm:$0xff]  }
 0x187   :  { %2184 = vmatpush1.bf16.msra.mxu0 %v4117_v61  ;;  %v4127_v58 = vld [vmem:[#allocation8 + $0x444] ss:$16 sps:$4 sm:$0xff]   ;;  %v4129_v54 = vld [vmem:[#allocation8 + $0x440] ss:$16 sps:$4 sm:$0xff]  }
 0x188   :  { %2225 = vmatpush1.bf16.msra.mxu1 %v4118_v4  ;;  %2185 = vmatprep.subr.bf16.mxu0 %v4119_v57  ;;  %v4128_v52 = vld [vmem:[#allocation8 + $0x644] ss:$16 sps:$4 sm:$0xff]   ;;  %v4130_v61 = vld [vmem:[#allocation8 + $0x640] ss:$16 sps:$4 sm:$0xff]  }
 0x189   :  { %2226 = vmatprep.subr.bf16.mxu1 %v4120_v33  ;;  %v4131_v4 = vld [vmem:[#allocation8 + $0x424] ss:$16 sps:$4 sm:$0xff]   ;;  %v4133_v33 = vld [vmem:[#allocation8 + $0x420] ss:$16 sps:$4 sm:$0xff]  }
 0x18a   :  { %v4132_v57 = vld [vmem:[#allocation8 + $0x624] ss:$16 sps:$4 sm:$0xff]  }
 0x18b   :  { %2186 = vmatpush1.bf16.msra.mxu0 %v4121_v56  ;;  %v4134_v56 = vld [vmem:[#allocation8 + $0x620] ss:$16 sps:$4 sm:$0xff]  }
 0x18c   :  { %2227 = vmatpush1.bf16.msra.mxu1 %v4122_v43  ;;  %2187 = vmatprep.subr.bf16.mxu0 %v4123_v53  ;;  %v4135_v43 = vld [vmem:[#allocation8 + $0x404] ss:$16 sps:$4 sm:$0xff]  }
 0x18d   :  { %2228 = vmatprep.subr.bf16.mxu1 %v4124_v3  ;;  %v4136_v53 = vld [vmem:[#allocation8 + $0x604] ss:$16 sps:$4 sm:$0xff]   ;;  %v4137_v3 = vld [vmem:[#allocation8 + $0x400] ss:$16 sps:$4 sm:$0xff]  }
 0x18f   :  { %2188 = vmatpush1.bf16.msra.mxu0 %v4125_v55  ;;  %v4138_v55 = vld [vmem:[#allocation8 + $0x600] ss:$16 sps:$4 sm:$0xff]  }
 0x190   :  { %2229 = vmatpush1.bf16.msra.mxu1 %v4126_v63  ;;  %2189 = vmatprep.subr.bf16.mxu0 %v4127_v58  ;;  %v4139_v63 = vld [vmem:[#allocation8 + $0x5e4] ss:$16 sps:$4 sm:$0xff]  }
 0x191   :  { %2230 = vmatprep.subr.bf16.mxu1 %v4128_v52  ;;  %v4140_v58 = vld [vmem:[#allocation8 + $0x7e4] ss:$16 sps:$4 sm:$0xff]   ;;  %v4141_v52 = vld [vmem:[#allocation8 + $0x5e0] ss:$16 sps:$4 sm:$0xff]  }
 0x193   :  { %2190 = vmatpush1.bf16.msra.mxu0 %v4129_v54  ;;  %v4142_v54 = vld [vmem:[#allocation8 + $0x7e0] ss:$16 sps:$4 sm:$0xff]  }
 0x194   :  { %2231 = vmatpush1.bf16.msra.mxu1 %v4130_v61  ;;  %2191 = vmatprep.subr.bf16.mxu0 %v4131_v4  ;;  %v4143_v61 = vld [vmem:[#allocation8 + $0x5c4] ss:$16 sps:$4 sm:$0xff]  }
 0x195   :  { %2232 = vmatprep.subr.bf16.mxu1 %v4132_v57  ;;  %v4144_v4 = vld [vmem:[#allocation8 + $0x7c4] ss:$16 sps:$4 sm:$0xff]   ;;  %v4145_v57 = vld [vmem:[#allocation8 + $0x5c0] ss:$16 sps:$4 sm:$0xff]  }
 0x197   :  { %2192 = vmatpush1.bf16.msra.mxu0 %v4133_v33  ;;  %v4146_v33 = vld [vmem:[#allocation8 + $0x7c0] ss:$16 sps:$4 sm:$0xff]  }
 0x198   :  { %2233 = vmatpush1.bf16.msra.mxu1 %v4134_v56  ;;  %2193 = vmatprep.subr.bf16.mxu0 %v4135_v43  ;;  %v4147_v56 = vld [vmem:[#allocation8 + $0x5a4] ss:$16 sps:$4 sm:$0xff]  }
 0x199   :  { %2234 = vmatprep.subr.bf16.mxu1 %v4136_v53  ;;  %v4148_v43 = vld [vmem:[#allocation8 + $0x7a4] ss:$16 sps:$4 sm:$0xff]   ;;  %v4149_v53 = vld [vmem:[#allocation8 + $0x5a0] ss:$16 sps:$4 sm:$0xff]  }
 0x19b   :  { %2194 = vmatpush1.bf16.msra.mxu0 %v4137_v3  ;;  %v4150_v3 = vld [vmem:[#allocation8 + $0x7a0] ss:$16 sps:$4 sm:$0xff]  }
 0x19c   :  { %2235 = vmatpush1.bf16.msra.mxu1 %v4138_v55  ;;  %2195 = vmatprep.subr.bf16.mxu0 %v4139_v63  ;;  %v4151_v55 = vld [vmem:[#allocation8 + $0x584] ss:$16 sps:$4 sm:$0xff]  }
 0x19d   :  { %2236 = vmatprep.subr.bf16.mxu1 %v4140_v58  ;;  %v4152_v63 = vld [vmem:[#allocation8 + $0x784] ss:$16 sps:$4 sm:$0xff]   ;;  %v4153_v58 = vld [vmem:[#allocation8 + $0x580] ss:$16 sps:$4 sm:$0xff]  }
 0x19f   :  { %2196 = vmatpush2.bf16.msra.mxu0 %v4141_v52  ;;  %v4154_v52 = vld [vmem:[#allocation8 + $0x780] ss:$16 sps:$4 sm:$0xff]  }
 0x1a0   :  { %2237 = vmatpush2.bf16.msra.mxu1 %v4142_v54  ;;  %2197 = vmatprep.subr.bf16.mxu0 %v4143_v61  ;;  %v4155_v54 = vld [vmem:[#allocation8 + $0x564] ss:$16 sps:$4 sm:$0xff]  }
 0x1a1   :  { %2238 = vmatprep.subr.bf16.mxu1 %v4144_v4  ;;  %v4156_v61 = vld [vmem:[#allocation8 + $0x764] ss:$16 sps:$4 sm:$0xff]   ;;  %v4157_v4 = vld [vmem:[#allocation8 + $0x560] ss:$16 sps:$4 sm:$0xff]  }
 0x1a3   :  { %2198 = vmatpush2.bf16.msra.mxu0 %v4145_v57  ;;  %v4158_v57 = vld [vmem:[#allocation8 + $0x760] ss:$16 sps:$4 sm:$0xff]  }
 0x1a4   :  { %2239 = vmatpush2.bf16.msra.mxu1 %v4146_v33  ;;  %2199 = vmatprep.subr.bf16.mxu0 %v4147_v56  ;;  %v4159_v33 = vld [vmem:[#allocation8 + $0x544] ss:$16 sps:$4 sm:$0xff]  }
 0x1a5   :  { %2240 = vmatprep.subr.bf16.mxu1 %v4148_v43  ;;  %v4160_v56 = vld [vmem:[#allocation8 + $0x744] ss:$16 sps:$4 sm:$0xff]   ;;  %v4161_v43 = vld [vmem:[#allocation8 + $0x540] ss:$16 sps:$4 sm:$0xff]  }
 0x1a7   :  { %2200 = vmatpush2.bf16.msra.mxu0 %v4149_v53  ;;  %v4162_v53 = vld [vmem:[#allocation8 + $0x740] ss:$16 sps:$4 sm:$0xff]  }
 0x1a8   :  { %2241 = vmatpush2.bf16.msra.mxu1 %v4150_v3  ;;  %2201 = vmatprep.subr.bf16.mxu0 %v4151_v55  ;;  %v4163_v3 = vld [vmem:[#allocation8 + $0x524] ss:$16 sps:$4 sm:$0xff]  }
 0x1a9   :  { %2242 = vmatprep.subr.bf16.mxu1 %v4152_v63  ;;  %v4164_v55 = vld [vmem:[#allocation8 + $0x724] ss:$16 sps:$4 sm:$0xff]   ;;  %v4165_v63 = vld [vmem:[#allocation8 + $0x520] ss:$16 sps:$4 sm:$0xff]  }
 0x1ab   :  { %2202 = vmatpush2.bf16.msra.mxu0 %v4153_v58  ;;  %v4166_v58 = vld [vmem:[#allocation8 + $0x720] ss:$16 sps:$4 sm:$0xff]  }
 0x1ac   :  { %2243 = vmatpush2.bf16.msra.mxu1 %v4154_v52  ;;  %2203 = vmatprep.subr.bf16.mxu0 %v4155_v54  ;;  %v4167_v52 = vld [vmem:[#allocation8 + $0x504] ss:$16 sps:$4 sm:$0xff]  }
 0x1ad   :  { %2244 = vmatprep.subr.bf16.mxu1 %v4156_v61  ;;  %v4168_v54 = vld [vmem:[#allocation8 + $0x704] ss:$16 sps:$4 sm:$0xff]   ;;  %v4792_v61 = vpack.c.bf16 %v4757_v0, %v4757_v0 }
 0x1af   :  { %2204 = vmatpush2.bf16.msra.mxu0 %v4157_v4  ;;  %v4796_v4 = vpack.c.bf16 %v4760_v7, %v4760_v7  ;;  %v4174_v7 = vld [vmem:[#allocation8 + $0x2e8] ss:$16 sps:$4 sm:$0xff]  }
 0x1b0   :  { %2245 = vmatpush2.bf16.msra.mxu1 %v4158_v57  ;;  %2205 = vmatprep.subr.bf16.mxu0 %v4159_v33  ;;  %v4169_v57 = vld [vmem:[#allocation8 + $0x500] ss:$16 sps:$4 sm:$0xff]  }
 0x1b1   :  { %2246 = vmatprep.subr.bf16.mxu1 %v4160_v56  ;;  %v4170_v33 = vld [vmem:[#allocation8 + $0x700] ss:$16 sps:$4 sm:$0xff]   ;;  %v4171_v56 = vld [vmem:[#allocation8 + $0xec] ss:$16 sps:$4 sm:$0xff]  }
 0x1b3   :  { %2206 = vmatpush2.bf16.msra.mxu0 %v4161_v43  ;;  %v4172_v43 = vld [vmem:[#allocation8 + $0x2ec] ss:$16 sps:$4 sm:$0xff]  }
 0x1b4   :  { %2247 = vmatpush2.bf16.msra.mxu1 %v4162_v53  ;;  %2207 = vmatprep.subr.bf16.mxu0 %v4163_v3 }
 0x1b5   :  { %2248 = vmatprep.subr.bf16.mxu1 %v4164_v55  ;;  %v4173_v55 = vld [vmem:[#allocation8 + $0xe8] ss:$16 sps:$4 sm:$0xff]  }
 0x1b7   :  { %2208 = vmatpush2.bf16.msra.mxu0 %v4165_v63 }
 0x1b8   :  { %2249 = vmatpush2.bf16.msra.mxu1 %v4166_v58  ;;  %2209 = vmatprep.subr.bf16.mxu0 %v4167_v52  ;;  %v4175_v52 = vld [vmem:[#allocation8 + $0xcc] ss:$16 sps:$4 sm:$0xff]  }
 0x1b9   :  { %2250 = vmatprep.subr.bf16.mxu1 %v4168_v54  ;;  %v4176_v54 = vld [vmem:[#allocation8 + $0x2cc] ss:$16 sps:$4 sm:$0xff]  }
 0x1bb   :  { %2210 = vmatpush2.bf16.msra.mxu0 %v4169_v57 }
 0x1bc   :  { %2251 = vmatpush2.bf16.msra.mxu1 %v4170_v33  ;;  %2261 = vmatprep.subr.bf16.mxu0 %v4171_v56 }
 0x1bd   :  { %2302 = vmatprep.subr.bf16.mxu1 %v4172_v43  ;;  %v4177_v43 = vld [vmem:[#allocation8 + $0xc8] ss:$16 sps:$4 sm:$0xff]  }
 0x1be   :  { %v1887_v53 = vpop.f32.mrf.mxu0  ;;  %2212 = vmatmul.mubr.bf16.vlgmr.msra.gmra.mxu0 %v4792_v61 }
 0x1bf   :  { %v1928_v3 = vpop.f32.mrf.mxu1  ;;  %2253 = vmatmul.mubr.bf16.vlgmr.msra.gmra.mxu1 %v4796_v4  ;;  %2262 = vmatpush1.bf16.msra.mxu0 %v4173_v55 }
 0x1c0   :  { %v4800_v0 = vadd.f32 %v1928_v3, %v1887_v53  ;;  %2303 = vmatpush1.bf16.msra.mxu1 %v4174_v7  ;;  %v1889_v63 = vpop.f32.mrf.mxu0  ;;  %2263 = vmatprep.subr.bf16.mxu0 %v4175_v52  ;;  %v4178_v53 = vld [vmem:[#allocation8 + $0x2c8] ss:$16 sps:$4 sm:$0xff]   ;;  %v4179_v7 = vld [vmem:[#allocation8 + $0xac] ss:$16 sps:$4 sm:$0xff]  }
 0x1c1   :  { %v1930_v58 = vpop.f32.mrf.mxu1  ;;  %2304 = vmatprep.subr.bf16.mxu1 %v4176_v54  ;;  %2293 = vmatprep.mubr.bf16.mxu0 %v4744_v8  ;;  %v4181_v52 = vld [vmem:[#allocation8 + $0xa8] ss:$16 sps:$4 sm:$0xff]   ;;  %v4184_v8 = vld [vmem:[#allocation8 + $0x28c] ss:$16 sps:$4 sm:$0xff]  }
 0x1c2   :  { %v4802_v57 = vadd.f32 %v1930_v58, %v1889_v63  ;;  %2334 = vmatprep.mubr.bf16.mxu1 %v4746_v6  ;;  %v1891_v33 = vpop.f32.mrf.mxu0  ;;  %v4182_v63 = vld [vmem:[#allocation8 + $0x2a8] ss:$16 sps:$4 sm:$0xff]   ;;  %v4183_v58 = vld [vmem:[#allocation8 + $0x8c] ss:$16 sps:$4 sm:$0xff]  }
 0x1c3   :  { %v1932_v56 = vpop.f32.mrf.mxu1  ;;  %2264 = vmatpush1.bf16.msra.mxu0 %v4177_v43  ;;  %v4185_v6 = vld [vmem:[#allocation8 + $0x88] ss:$16 sps:$4 sm:$0xff]   ;;  %v4187_v33 = vld [vmem:[#allocation8 + $0x6c] ss:$16 sps:$4 sm:$0xff]  }
 0x1c4   :  { %2305 = vmatpush1.bf16.msra.mxu1 %v4178_v53  ;;  %v1892_v3 = vpop.f32.mrf.mxu0  ;;  %2265 = vmatprep.subr.bf16.mxu0 %v4179_v7  ;;  %v4186_v54 = vld [vmem:[#allocation8 + $0x288] ss:$16 sps:$4 sm:$0xff]   ;;  %v4188_v56 = vld [vmem:[#allocation8 + $0x26c] ss:$16 sps:$4 sm:$0xff]  }
 0x1c5   :  { %v1933_v55 = vpop.f32.mrf.mxu1  ;;  %2306 = vmatprep.subr.bf16.mxu1 %v4180_v9  ;;  %v4189_v43 = vld [vmem:[#allocation8 + $0x68] ss:$16 sps:$4 sm:$0xff]   ;;  %v4191_v9 = vld [vmem:[#allocation8 + $0x4c] ss:$16 sps:$4 sm:$0xff]  }
 0x1c6   :  { %v4190_v53 = vld [vmem:[#allocation8 + $0x268] ss:$16 sps:$4 sm:$0xff]   ;;  %v4192_v3 = vld [vmem:[#allocation8 + $0x24c] ss:$16 sps:$4 sm:$0xff]  }
 0x1c7   :  { %2266 = vmatpush1.bf16.msra.mxu0 %v4181_v52  ;;  %v4193_v55 = vld [vmem:[#allocation8 + $0x48] ss:$16 sps:$4 sm:$0xff]   ;;  %v4195_v52 = vld [vmem:[#allocation8 + $0x2c] ss:$16 sps:$4 sm:$0xff]  }
 0x1c8   :  { %2307 = vmatpush1.bf16.msra.mxu1 %v4182_v63  ;;  %2267 = vmatprep.subr.bf16.mxu0 %v4183_v58  ;;  %v4194_v7 = vld [vmem:[#allocation8 + $0x248] ss:$16 sps:$4 sm:$0xff]   ;;  %v4196_v63 = vld [vmem:[#allocation8 + $0x22c] ss:$16 sps:$4 sm:$0xff]  }
 0x1c9   :  { %2308 = vmatprep.subr.bf16.mxu1 %v4184_v8  ;;  %v4197_v58 = vld [vmem:[#allocation8 + $0x28] ss:$16 sps:$4 sm:$0xff]  }
 0x1ca   :  { %v4198_v8 = vld [vmem:[#allocation8 + $0x228] ss:$16 sps:$4 sm:$0xff]  }
 0x1cb   :  { %2268 = vmatpush1.bf16.msra.mxu0 %v4185_v6  ;;  %v4199_v6 = vld [vmem:[#allocation8 + $0xc] ss:$16 sps:$4 sm:$0xff]  }
 0x1cc   :  { %2309 = vmatpush1.bf16.msra.mxu1 %v4186_v54  ;;  %2269 = vmatprep.subr.bf16.mxu0 %v4187_v33  ;;  %v4200_v54 = vld [vmem:[#allocation8 + $0x20c] ss:$16 sps:$4 sm:$0xff]   ;;  %v4201_v33 = vld [vmem:[#allocation8 + $0x8] ss:$16 sps:$4 sm:$0xff]  }
 0x1cd   :  { %2310 = vmatprep.subr.bf16.mxu1 %v4188_v56  ;;  %v4202_v56 = vld [vmem:[#allocation8 + $0x208] ss:$16 sps:$4 sm:$0xff]  }
 0x1cf   :  { %2270 = vmatpush1.bf16.msra.mxu0 %v4189_v43  ;;  %v4203_v43 = vld [vmem:[#allocation8 + $0x1ec] ss:$16 sps:$4 sm:$0xff]  }
 0x1d0   :  { %2311 = vmatpush1.bf16.msra.mxu1 %v4190_v53  ;;  %2271 = vmatprep.subr.bf16.mxu0 %v4191_v9  ;;  %v4204_v53 = vld [vmem:[#allocation8 + $0x3ec] ss:$16 sps:$4 sm:$0xff]   ;;  %v4205_v9 = vld [vmem:[#allocation8 + $0x1e8] ss:$16 sps:$4 sm:$0xff]  }
 0x1d1   :  { %2312 = vmatprep.subr.bf16.mxu1 %v4192_v3  ;;  %v4206_v3 = vld [vmem:[#allocation8 + $0x3e8] ss:$16 sps:$4 sm:$0xff]  }
 0x1d3   :  { %2272 = vmatpush1.bf16.msra.mxu0 %v4193_v55  ;;  %v4207_v55 = vld [vmem:[#allocation8 + $0x1cc] ss:$16 sps:$4 sm:$0xff]  }
 0x1d4   :  { %2313 = vmatpush1.bf16.msra.mxu1 %v4194_v7  ;;  %2273 = vmatprep.subr.bf16.mxu0 %v4195_v52  ;;  %v4208_v7 = vld [vmem:[#allocation8 + $0x3cc] ss:$16 sps:$4 sm:$0xff]  }
 0x1d5   :  { %2314 = vmatprep.subr.bf16.mxu1 %v4196_v63  ;;  %v5216_v63 = vld [vmem:[#allocation39_spill] sm:$0xff] }
 0x1d7   :  { %2274 = vmatpush1.bf16.msra.mxu0 %v4197_v58  ;;  %v5217_v58 = vld [vmem:[#allocation40_spill] sm:$0xff] }
 0x1d8   :  { %2315 = vmatpush1.bf16.msra.mxu1 %v4198_v8  ;;  %2275 = vmatprep.subr.bf16.mxu0 %v4199_v6  ;;  %v5218_v8 = vld [vmem:[#allocation41_spill] sm:$0xff]  ;;  %v5219_v6 = vld [vmem:[#allocation42_spill] sm:$0xff] }
 0x1d9   :  { %2316 = vmatprep.subr.bf16.mxu1 %v4200_v54 }
 0x1db   :  { %2276 = vmatpush1.bf16.msra.mxu0 %v4201_v33 }
 0x1dc   :  { %2317 = vmatpush1.bf16.msra.mxu1 %v4202_v56  ;;  %2277 = vmatprep.subr.bf16.mxu0 %v4203_v43  ;;  %v5220_v56 = vld [vmem:[#allocation43_spill] sm:$0xff]  ;;  %v5221_v43 = vld [vmem:[#allocation44_spill] sm:$0xff] }
 0x1dd   :  { %2318 = vmatprep.subr.bf16.mxu1 %v4204_v53  ;;  %v5222_v53 = vld [vmem:[#allocation45_spill] sm:$0xff] }
 0x1df   :  { %2278 = vmatpush2.bf16.msra.mxu0 %v4205_v9  ;;  %v5223_v9 = vld [vmem:[#allocation46_spill] sm:$0xff] }
 0x1e0   :  { %2319 = vmatpush2.bf16.msra.mxu1 %v4206_v3  ;;  %2279 = vmatprep.subr.bf16.mxu0 %v4207_v55 }
 0x1e1   :  { %2320 = vmatprep.subr.bf16.mxu1 %v4208_v7  ;;  %v5224_v7 = vld [vmem:[#allocation47_spill] sm:$0xff] }
 0x1e3   :  { %2280 = vmatpush2.bf16.msra.mxu0 %v4460_v10 }
 0x1e4   :  { %2321 = vmatpush2.bf16.msra.mxu1 %v4462_v11  ;;  %2281 = vmatprep.subr.bf16.mxu0 %v4464_v12 }
 0x1e5   :  { %2322 = vmatprep.subr.bf16.mxu1 %v4466_v13 }
 0x1e7   :  { %2282 = vmatpush2.bf16.msra.mxu0 %v4470_v14 }
 0x1e8   :  { %2323 = vmatpush2.bf16.msra.mxu1 %v4472_v15  ;;  %2283 = vmatprep.subr.bf16.mxu0 %v4476_v18 }
 0x1e9   :  { %2324 = vmatprep.subr.bf16.mxu1 %v4478_v19 }
 0x1eb   :  { %2284 = vmatpush2.bf16.msra.mxu0 %v4480_v20 }
 0x1ec   :  { %2325 = vmatpush2.bf16.msra.mxu1 %v4482_v21  ;;  %2285 = vmatprep.subr.bf16.mxu0 %v4484_v22 }
 0x1ed   :  { %2326 = vmatprep.subr.bf16.mxu1 %v4486_v23 }
 0x1ef   :  { %2286 = vmatpush2.bf16.msra.mxu0 %v4492_v24 }
 0x1f0   :  { %2327 = vmatpush2.bf16.msra.mxu1 %v4494_v25  ;;  %2287 = vmatprep.subr.bf16.mxu0 %v4496_v26  ;;  %v5193_v25 = vcombine.low %v4781_v2, %v4786_v60  ;;  %v5215_v2 = vld [vmem:[#allocation38_spill] sm:$0xff] }
 0x1f1   :  { %2328 = vmatprep.subr.bf16.mxu1 %v4498_v27 }
 0x1f2   :  { %v2029_v26 = vrot.slane %v5193_v25, %v4416_v49 }
 0x1f3   :  { %2288 = vmatpush2.bf16.msra.mxu0 %v4504_v28  ;;  %v5194_v28 = vld [vmem:[#allocation18_spill] sm:$0xff] }
 0x1f4   :  { %2329 = vmatpush2.bf16.msra.mxu1 %v4506_v29  ;;  %2289 = vmatprep.subr.bf16.mxu0 %v4508_v30  ;;  %v5195_v30 = vld [vmem:[#allocation19_spill] sm:$0xff] }
 0x1f5   :  { %2330 = vmatprep.subr.bf16.mxu1 %v4510_v31  ;;  %v5196_v31 = vld [vmem:[#allocation20_spill] sm:$0xff] }
 0x1f7   :  { %2290 = vmatpush2.bf16.msra.mxu0 %v4516_v34  ;;  %v5197_v34 = vld [vmem:[#allocation21_spill] sm:$0xff] }
 0x1f8   :  { %2331 = vmatpush2.bf16.msra.mxu1 %v4518_v35  ;;  %2291 = vmatprep.subr.bf16.mxu0 %v4520_v36  ;;  %v5198_v35 = vld [vmem:[#allocation22_spill] sm:$0xff]  ;;  %v5199_v36 = vld [vmem:[#allocation23_spill] sm:$0xff] }
 0x1f9   :  { %2332 = vmatprep.subr.bf16.mxu1 %v4526_v37  ;;  %v5200_v37 = vld [vmem:[#allocation24_spill] sm:$0xff] }
 0x1fb   :  { %2292 = vmatpush2.bf16.msra.mxu0 %v4528_v38  ;;  %v5201_v38 = vld [vmem:[#allocation25_spill] sm:$0xff] }
 0x1fc   :  { %2333 = vmatpush2.bf16.msra.mxu1 %v4530_v39  ;;  %2343 = vmatprep.subr.bf16.mxu0 %v4532_v40  ;;  %v5202_v39 = vld [vmem:[#allocation26_spill] sm:$0xff]  ;;  %v5203_v40 = vld [vmem:[#allocation27_spill] sm:$0xff] }
 0x1fd   :  { %2384 = vmatprep.subr.bf16.mxu1 %v4534_v41  ;;  %v5204_v41 = vld [vmem:[#allocation28_spill] sm:$0xff] }
 0x1fe   :  { %v1969_v10 = vpop.f32.mrf.mxu0  ;;  %2294 = vmatmul.mubr.bf16.vlgmr.msra.gmra.mxu0 %v4768_v32  ;;  %v5212_v32 = vld [vmem:[#allocation35_spill] sm:$0xff] }
 0x1ff   :  { %v2010_v11 = vpop.f32.mrf.mxu1  ;;  %2335 = vmatmul.mubr.bf16.vlgmr.msra.gmra.mxu1 %v4772_v5  ;;  %v1970_v12 = vadd.f32 %v1969_v10, %v4800_v0  ;;  %2344 = vmatpush1.bf16.msra.mxu0 %v4540_v42  ;;  %v5205_v42 = vld [vmem:[#allocation29_spill] sm:$0xff]  ;;  %v5213_v5 = vld [vmem:[#allocation36_spill] sm:$0xff] }
 0x200   :  { %2385 = vmatpush1.bf16.msra.mxu1 %v4542_v44  ;;  %v1971_v13 = vpop.f32.mrf.mxu0  ;;  %2345 = vmatprep.subr.bf16.mxu0 %v4544_v45  ;;  %v5206_v44 = vld [vmem:[#allocation30_spill] sm:$0xff]  ;;  %v5207_v45 = vld [vmem:[#allocation31_spill] sm:$0xff]  ;;  %v5225_v10 = vld [vmem:[#allocation48_spill] sm:$0xff] }
 0x201   :  { %v2012_v14 = vpop.f32.mrf.mxu1  ;;  %2386 = vmatprep.subr.bf16.mxu1 %v4546_v46  ;;  %v1972_v15 = vadd.f32 %v1971_v13, %v4802_v57  ;;  %2375 = vmatprep.mubr.bf16.mxu0 %v4774_v1  ;;  %v2011_v20 = vadd.f32 %v2010_v11, %v1970_v12  ;;  %v5208_v46 = vld [vmem:[#allocation32_spill] sm:$0xff]  ;;  %v5226_v11 = vld [vmem:[#allocation49_spill] sm:$0xff]  ;;  %v5227_v12 = vld [vmem:[#allocation50_spill] sm:$0xff] }
 0x202   :  { %2416 = vmatprep.mubr.bf16.mxu1 %v4776_v59  ;;  %v1973_v18 = vpop.f32.mrf.mxu0  ;;  %v2452_v1 = vld [vmem:[%s5083_s3] sm:$0xf] }
 0x203   :  { %v2014_v19 = vpop.f32.mrf.mxu1  ;;  %v2013_v21 = vadd.f32 %v2012_v14, %v1972_v15  ;;  %2346 = vmatpush1.bf16.msra.mxu0 %v4552_v47  ;;  %v5209_v47 = vld [vmem:[#allocation33_spill] sm:$0xff]  ;;  %v5228_v14 = vld [vmem:[#allocation51_spill] sm:$0xff]  ;;  %v5229_v15 = vld [vmem:[#allocation52_spill] sm:$0xff] }
 0x204   :  { %2387 = vmatpush1.bf16.msra.mxu1 %v4554_v48  ;;  %v1974_v22 = vpop.f32.mrf.mxu0  ;;  %2347 = vmatprep.subr.bf16.mxu0 %v4558_v50  ;;  %v5210_v48 = vld [vmem:[#allocation34_spill] sm:$0xff]  ;;  %v5211_v50 = vld [vmem:[#allocation17_spill] sm:$0xff] }
 0x205   :  { %v2015_v23 = vpop.f32.mrf.mxu1  ;;  %2388 = vmatprep.subr.bf16.mxu1 %v4560_v51  ;;  %v2022_v24 = vcombine.low %v2011_v20, %v2013_v21  ;;  %v2538_v51 = vsub.s32 0, %v5211_v50  ;;  %v5214_v59 = vld [vmem:[#allocation37_spill] sm:$0xff]  ;;  %v5231_v19 = vld [vmem:[#allocation54_spill] sm:$0xff]  ;;  %v5232_v21 = vld [vmem:[#allocation55_spill] sm:$0xff] }
 0x206   :  { %v5230_v18 = vld [vmem:[#allocation53_spill] sm:$0xff]  ;;  %v5233_v22 = vld [vmem:[#allocation56_spill] sm:$0xff] }
 0x207   :  { %v2036_v27 = vrot.slane %v2022_v24, %v4416_v49  ;;  %2348 = vmatpush1.bf16.msra.mxu0 %v4570_v16  ;;  %v2542_v16 = vsub.s32 1, %v5211_v50  ;;  %v2539_v60 = vrot.slane %v2452_v1, %v2538_v51  ;;  %v5234_v23 = vld [vmem:[#allocation57_spill] sm:$0xff]  ;;  %v5235_v24 = vld [vmem:[#allocation58_spill] sm:$0xff] }
 0x208   :  { %2389 = vmatpush1.bf16.msra.mxu1 %v4572_v17  ;;  %2349 = vmatprep.subr.bf16.mxu0 %v4576_v62  ;;  %v2546_v17 = vsub.s32 2, %v5211_v50  ;;  %v2550_v62 = vsub.s32 3, %v5211_v50  ;;  %v4941_v50 = vld [vmem:[#allocation9 + $0xf0] sm:$0xff]  }
 0x209   :  { %2390 = vmatprep.subr.bf16.mxu1 %v5194_v28  ;;  %v2037_v29 = vcombine.low %v2029_v26, %v2036_v27  ;;  %v2543_v0 = vrot.slane %v2452_v1, %v2542_v16  ;;  %v5236_v26 = vld [vmem:[#allocation59_spill] sm:$0xff]  ;;  %v5237_v27 = vld [vmem:[#allocation60_spill] sm:$0xff]  ;;  %v5238_v28 = vld [vmem:[#allocation61_spill] sm:$0xff] }
 0x20a   :  { %v2547_v57 = vrot.slane %v2452_v1, %v2546_v17  ;;  %v2551_v52 = vrot.slane %v2452_v1, %v2550_v62 }
 0x20b   :  { %2350 = vmatpush1.bf16.msra.mxu0 %v5195_v30  ;;  %v2552_v54 = vcombine.low %v2539_v60, %v2543_v0  ;;  %v5239_v30 = vld [vmem:[#allocation62_spill] sm:$0xff] }
 0x20c   :  { %2391 = vmatpush1.bf16.msra.mxu1 %v5196_v31  ;;  %2351 = vmatprep.subr.bf16.mxu0 %v5197_v34  ;;  %v2553_v33 = vcombine.low %v2547_v57, %v2551_v52  ;;  %v5240_v34 = vld [vmem:[#allocation63_spill] sm:$0xff]  ;;  %v4009_v57 = vld [vmem:[#allocation9 + $0x28] sm:$0xff]  }
 0x20d   :  { %2392 = vmatprep.subr.bf16.mxu1 %v5198_v35  ;;  %v2560_v3 = vrot.slane %v2552_v54, %v4416_v49  ;;  %v5241_v35 = vld [vmem:[#allocation64_spill] sm:$0xff] }
 0x20e   :  { %v2567_v55 = vrot.slane %v2553_v33, %v4416_v49  ;;  %v4013_v54 = vld [vmem:[#allocation9 + $0x20] sm:$0xff]  }
 0x20f   :  { %2352 = vmatpush1.bf16.msra.mxu0 %v5199_v36  ;;  %v5242_v36 = vld [vmem:[#allocation65_spill] sm:$0xff] }
 0x210   :  { %2393 = vmatpush1.bf16.msra.mxu1 %v5200_v37  ;;  %2353 = vmatprep.subr.bf16.mxu0 %v5201_v38  ;;  %v4898_v13 = vcombine.low %v2560_v3, %v2567_v55  ;;  %v5243_v37 = vld [vmem:[#allocation66_spill] sm:$0xff]  ;;  %v4923_v38 = vld [vmem:[#allocation9 + $0x78] sm:$0xff]   ;;  %v4970_v33 = vld [vmem:[#allocation9 + $0xa0] sm:$0xff]  }
 0x211   :  { %2394 = vmatprep.subr.bf16.mxu1 %v5202_v39  ;;  %v4925_v39 = vld [vmem:[#allocation9 + $0xf8] sm:$0xff]   ;;  %v4019_v3 = vld [vmem:[#allocation9 + $0x50] sm:$0xff]  }
 0x212   :  { %v2570_v20 = vadd.f32 %v4898_v13, %v2037_v29  ;;  %v4979_v55 = vld [vmem:[#allocation9 + $0xd0] sm:$0xff]  }
 0x213   :  { %2354 = vmatpush1.bf16.msra.mxu0 %v5203_v40 }
 0x214   :  { %2395 = vmatpush1.bf16.msra.mxu1 %v5204_v41  ;;  %2355 = vmatprep.subr.bf16.mxu0 %v5205_v42  ;;  %v2572_v25 = vcombine.high %v2570_v20, %v2570_v20  ;;  %v4914_v31 = vrot.slane %v2570_v20, %v4416_v49  ;;  %v5244_v42 = vld [vmem:[#allocation67_spill] sm:$0xff]  ;;  %v4029_v20 = vld [vmem:[#allocation9] sm:$0xff]  }
 0x215   :  { %2396 = vmatprep.subr.bf16.mxu1 %v5206_v44  ;;  %v5245_v44 = vld [vmem:[#allocation68_spill] sm:$0xff] }
 0x216   :  { %v4917_v29 = vrot.slane %v2572_v25, %v4416_v49  ;;  %v2587_v40 = vcombine.high %v4914_v31, %v4914_v31 }
 0x217   :  { %2356 = vmatpush1.bf16.msra.mxu0 %v5207_v45  ;;  %v4933_v45 = vld [vmem:[#allocation9 + $0x38] sm:$0xff]  }
 0x218   :  { %2397 = vmatpush1.bf16.msra.mxu1 %v5208_v46  ;;  %2357 = vmatprep.subr.bf16.mxu0 %v5209_v47  ;;  %v2588_v41 = vcombine.high %v4917_v29, %v4917_v29  ;;  %v4937_v46 = vld [vmem:[#allocation9 + $0xb8] sm:$0xff]   ;;  %v2594_v47 = vpack.c.bf16 %v2587_v40, %v2587_v40 }
 0x219   :  { %2398 = vmatprep.subr.bf16.mxu1 %v5210_v48  ;;  %v4939_v48 = vld [vmem:[#allocation9 + $0x70] sm:$0xff]   ;;  %v4031_v40 = vld [vmem:[#allocation11 + $0x38] sm:$0xff]  }
 0x21a   :  { %v2596_v17 = vpack.c.bf16 %v2588_v41, %v2588_v41  ;;  %v4347_v41 = vmov 0.0  }
 0x21b   :  { %2358 = vmatpush1.bf16.msra.mxu0 %v5212_v32  ;;  %v4948_v32 = vld [vmem:[#allocation9 + $0x30] sm:$0xff]  }
 0x21c   :  { %2399 = vmatpush1.bf16.msra.mxu1 %v5213_v5  ;;  %2359 = vmatprep.subr.bf16.mxu0 %v5214_v59  ;;  %v4951_v59 = vld [vmem:[#allocation9 + $0xb0] sm:$0xff]  }
 0x21d   :  { %2400 = vmatprep.subr.bf16.mxu1 %v5215_v2  ;;  %v4953_v2 = vld [vmem:[#allocation9 + $0x68] sm:$0xff]  }
 0x21f   :  { %2360 = vmatpush2.bf16.msra.mxu0 %v5216_v63 }
 0x220   :  { %2401 = vmatpush2.bf16.msra.mxu1 %v5217_v58  ;;  %2361 = vmatprep.subr.bf16.mxu0 %v5218_v8  ;;  %v4964_v58 = vld [vmem:[#allocation9 + $0xa8] sm:$0xff]   ;;  %v4011_v8 = vld [vmem:[#allocation9 + $0x60] sm:$0xff]  }
 0x221   :  { %2402 = vmatprep.subr.bf16.mxu1 %v5219_v6  ;;  %v4967_v6 = vld [vmem:[#allocation9 + $0xe0] sm:$0xff]  }
 0x223   :  { %2362 = vmatpush2.bf16.msra.mxu0 %v5220_v56  ;;  %v4015_v56 = vld [vmem:[#allocation9 + $0x58] sm:$0xff]  }
 0x224   :  { %2403 = vmatpush2.bf16.msra.mxu1 %v5221_v43  ;;  %2363 = vmatprep.subr.bf16.mxu0 %v5222_v53  ;;  %v4973_v43 = vld [vmem:[#allocation9 + $0xd8] sm:$0xff]  }
 0x225   :  { %2404 = vmatprep.subr.bf16.mxu1 %v5223_v9  ;;  %v4017_v53 = vld [vmem:[#allocation9 + $0x18] sm:$0xff]  }
 0x226   :  { %v4976_v9 = vld [vmem:[#allocation9 + $0x98] sm:$0xff]  }
 0x227   :  { %2364 = vmatpush2.bf16.msra.mxu0 %v5224_v7  ;;  %v4021_v7 = vld [vmem:[#allocation9 + $0x10] sm:$0xff]  }
 0x228   :  { %2405 = vmatpush2.bf16.msra.mxu1 %v5225_v10  ;;  %2365 = vmatprep.subr.bf16.mxu0 %v5226_v11  ;;  %v4982_v10 = vld [vmem:[#allocation9 + $0x90] sm:$0xff]   ;;  %v4023_v11 = vld [vmem:[#allocation9 + $0x48] sm:$0xff]  }
 0x229   :  { %2406 = vmatprep.subr.bf16.mxu1 %v5227_v12  ;;  %v4985_v12 = vld [vmem:[#allocation9 + $0xc8] sm:$0xff]  }
 0x22b   :  { %2366 = vmatpush2.bf16.msra.mxu0 %v5228_v14  ;;  %v4025_v14 = vld [vmem:[#allocation9 + $0x8] sm:$0xff]  }
 0x22c   :  { %2407 = vmatpush2.bf16.msra.mxu1 %v5229_v15  ;;  %2367 = vmatprep.subr.bf16.mxu0 %v5230_v18  ;;  %v4988_v15 = vld [vmem:[#allocation9 + $0x88] sm:$0xff]   ;;  %v4027_v18 = vld [vmem:[#allocation9 + $0x40] sm:$0xff]  }
 0x22d   :  { %2408 = vmatprep.subr.bf16.mxu1 %v5231_v19  ;;  %v4991_v19 = vld [vmem:[#allocation9 + $0xc0] sm:$0xff]  }
 0x22f   :  { %2368 = vmatpush2.bf16.msra.mxu0 %v5232_v21  ;;  %v4994_v21 = vld [vmem:[#allocation9 + $0x80] sm:$0xff]  }
 0x230   :  { %2409 = vmatpush2.bf16.msra.mxu1 %v5233_v22  ;;  %2369 = vmatprep.subr.bf16.mxu0 %v5234_v23  ;;  %v2593_v22 = vpack.c.bf16 %v4914_v31, %v4914_v31  ;;  %v2595_v23 = vpack.c.bf16 %v4917_v29, %v4917_v29 }
 0x231   :  { %2410 = vmatprep.subr.bf16.mxu1 %v5235_v24 }
 0x233   :  { %2370 = vmatpush2.bf16.msra.mxu0 %v5236_v26 }
 0x234   :  { %2411 = vmatpush2.bf16.msra.mxu1 %v5237_v27  ;;  %2371 = vmatprep.subr.bf16.mxu0 %v5238_v28 }
 0x235   :  { %2412 = vmatprep.subr.bf16.mxu1 %v5239_v30 }
 0x237   :  { %2372 = vmatpush2.bf16.msra.mxu0 %v5240_v34 }
 0x238   :  { %2413 = vmatpush2.bf16.msra.mxu1 %v5241_v35  ;;  %2373 = vmatprep.subr.bf16.mxu0 %v5242_v36 }
 0x239   :  { %2414 = vmatprep.subr.bf16.mxu1 %v5243_v37 }
 0x23b   :  { %2374 = vmatpush2.bf16.msra.mxu0 %v5244_v42  ;;  %v4032_v42 = vld [vmem:[#allocation11 + $0x30] sm:$0xff]  }
 0x23c   :  { %2415 = vmatpush2.bf16.msra.mxu1 %v5245_v44  ;;  %3451 = vmatprep.subr.bf16.mxu0 %v4923_v38  ;;  %v4033_v44 = vld [vmem:[#allocation11 + $0x28] sm:$0xff]  }
 0x23d   :  { %3473 = vmatprep.subr.bf16.mxu1 %v4925_v39 }
 0x23e   :  { %v2131_v51 = vpop.f32.mrf.mxu0  ;;  %2376 = vmatmul.mubr.bf16.vlgmr.msra.gmra.mxu0 %v4792_v61 }
 0x23f   :  { %v2172_v16 = vpop.f32.mrf.mxu1  ;;  %2417 = vmatmul.mubr.bf16.vlgmr.msra.gmra.mxu1 %v4796_v4  ;;  %3452 = vmatpush3.bf16.msra.mxu0 %v4933_v45  ;;  %v4959_v4 = vld [vmem:[#allocation9 + $0xe8] sm:$0xff]  }
 0x240   :  { %v4945_v62 = vadd.f32 %v2172_v16, %v2131_v51  ;;  %2827 = vmatprep.mubr.bf16.mxu0 %v2594_v47  ;;  %3474 = vmatpush3.bf16.msra.mxu1 %v4937_v46  ;;  %v2133_v5 = vpop.f32.mrf.mxu0  ;;  %v5017_v47 = vld [vmem:[#allocation11 + $0x18] sm:$0xff]   ;;  %v5026_v51 = vld [vmem:[#allocation11 + $0x8] sm:$0xff]   ;;  %v5030_v16 = vld [vmem:[#allocation11] sm:$0xff]  }
 0x241   :  { %2867 = vmatprep.mubr.bf16.mxu1 %v2596_v17  ;;  %v2174_v1 = vpop.f32.mrf.mxu1  ;;  %3453 = vmatprep.subr.bf16.mxu0 %v4939_v48 }
 0x242   :  { %v4955_v61 = vadd.f32 %v2174_v1, %v2133_v5  ;;  %3475 = vmatprep.subr.bf16.mxu1 %v4941_v50  ;;  %v2135_v60 = vpop.f32.mrf.mxu0 }
 0x243   :  { %v2176_v0 = vpop.f32.mrf.mxu1  ;;  %3454 = vmatpush3.bf16.msra.mxu0 %v4948_v32 }
 0x244   :  { %3476 = vmatpush3.bf16.msra.mxu1 %v4951_v59  ;;  %v2136_v52 = vpop.f32.mrf.mxu0  ;;  %3455 = vmatprep.subr.bf16.mxu0 %v4953_v2 }
 0x245   :  { %v2177_v63 = vpop.f32.mrf.mxu1  ;;  %3477 = vmatprep.subr.bf16.mxu1 %v4959_v4 }
 0x247   :  { %3456 = vmatpush3.bf16.msra.mxu0 %v4009_v57 }
 0x248   :  { %3478 = vmatpush3.bf16.msra.mxu1 %v4964_v58  ;;  %3457 = vmatprep.subr.bf16.mxu0 %v4011_v8 }
 0x249   :  { %3479 = vmatprep.subr.bf16.mxu1 %v4967_v6 }
 0x24b   :  { %3458 = vmatpush3.bf16.msra.mxu0 %v4013_v54 }
 0x24c   :  { %3480 = vmatpush3.bf16.msra.mxu1 %v4970_v33  ;;  %3459 = vmatprep.subr.bf16.mxu0 %v4015_v56 }
 0x24d   :  { %3481 = vmatprep.subr.bf16.mxu1 %v4973_v43 }
 0x24f   :  { %3460 = vmatpush3.bf16.msra.mxu0 %v4017_v53 }
 0x250   :  { %3482 = vmatpush3.bf16.msra.mxu1 %v4976_v9  ;;  %3461 = vmatprep.subr.bf16.mxu0 %v4019_v3 }
 0x251   :  { %3483 = vmatprep.subr.bf16.mxu1 %v4979_v55 }
 0x253   :  { %3462 = vmatpush3.bf16.msra.mxu0 %v4021_v7 }
 0x254   :  { %3484 = vmatpush3.bf16.msra.mxu1 %v4982_v10  ;;  %3463 = vmatprep.subr.bf16.mxu0 %v4023_v11 }
 0x255   :  { %3485 = vmatprep.subr.bf16.mxu1 %v4985_v12 }
 0x257   :  { %3464 = vmatpush3.bf16.msra.mxu0 %v4025_v14 }
 0x258   :  { %3486 = vmatpush3.bf16.msra.mxu1 %v4988_v15  ;;  %3465 = vmatprep.subr.bf16.mxu0 %v4027_v18 }
 0x259   :  { %3487 = vmatprep.subr.bf16.mxu1 %v4991_v19 }
 0x25b   :  { %3466 = vmatpush3.bf16.msra.mxu0 %v4029_v20 }
 0x25c   :  { %3488 = vmatpush3.bf16.msra.mxu1 %v4994_v21  ;;  %3557 = vmatprep.subr.bf16.mxu0 %v4347_v41 }
 0x25d   :  { %3504 = vmatprep.subr.bf16.mxu1 %v4923_v38 }
 0x25e   :  { %2828 = vmatmul.mubr.bf16.vlgmr.msra.gmra.mxu0 %v2593_v22 }
 0x25f   :  { %2868 = vmatmul.mubr.bf16.vlgmr.msra.gmra.mxu1 %v2595_v23  ;;  %3558 = vmatpush3.bf16.msra.mxu0 %v4031_v40 }
 0x260   :  { %3505 = vmatpush3.bf16.msra.mxu1 %v4933_v45  ;;  %3559 = vmatprep.subr.bf16.mxu0 %v4347_v41  ;;  %v5014_v45 = vld [vmem:[#allocation11 + $0x20] sm:$0xff]  }
 0x261   :  { %3506 = vmatprep.subr.bf16.mxu1 %v4939_v48  ;;  %v5022_v48 = vld [vmem:[#allocation11 + $0x10] sm:$0xff]   ;;  %3573 = vmatprep.mubr.msk.bf16.mxu0 %vm4348_vm0, %v4347_v41 }
 0x263   :  { %3560 = vmatpush3.bf16.msra.mxu0 %v4032_v42 }
 0x264   :  { %3507 = vmatpush3.bf16.msra.mxu1 %v4948_v32  ;;  %3561 = vmatprep.subr.bf16.mxu0 %v4347_v41 }
 0x265   :  { %3508 = vmatprep.subr.bf16.mxu1 %v4953_v2 }
 0x267   :  { %3562 = vmatpush3.bf16.msra.mxu0 %v4033_v44 }
 0x268   :  { %3509 = vmatpush3.bf16.msra.mxu1 %v4009_v57  ;;  %3563 = vmatprep.subr.bf16.mxu0 %v4347_v41 }
 0x269   :  { %3510 = vmatprep.subr.bf16.mxu1 %v4011_v8 }
 0x26b   :  { %3564 = vmatpush3.bf16.msra.mxu0 %v5014_v45 }
 0x26c   :  { %3511 = vmatpush3.bf16.msra.mxu1 %v4013_v54  ;;  %3565 = vmatprep.subr.bf16.mxu0 %v4347_v41 }
 0x26d   :  { %3512 = vmatprep.subr.bf16.mxu1 %v4015_v56 }
 0x26f   :  { %3566 = vmatpush3.bf16.msra.mxu0 %v5017_v47 }
 0x270   :  { %3513 = vmatpush3.bf16.msra.mxu1 %v4017_v53  ;;  %3567 = vmatprep.subr.bf16.mxu0 %v4347_v41 }
 0x271   :  { %3514 = vmatprep.subr.bf16.mxu1 %v4019_v3 }
 0x273   :  { %3568 = vmatpush3.bf16.msra.mxu0 %v5022_v48 }
 0x274   :  { %3515 = vmatpush3.bf16.msra.mxu1 %v4021_v7  ;;  %3569 = vmatprep.subr.bf16.mxu0 %v4347_v41 }
 0x275   :  { %3516 = vmatprep.subr.bf16.mxu1 %v4023_v11 }
 0x277   :  { %3570 = vmatpush3.bf16.msra.mxu0 %v5026_v51 }
 0x278   :  { %3517 = vmatpush3.bf16.msra.mxu1 %v4025_v14  ;;  %3571 = vmatprep.subr.bf16.mxu0 %v4347_v41 }
 0x279   :  { %3518 = vmatprep.subr.bf16.mxu1 %v4027_v18 }
 0x27b   :  { %3572 = vmatpush3.bf16.msra.mxu0 %v5030_v16 }
 0x27c   :  { %3519 = vmatpush3.bf16.msra.mxu1 %v4029_v20  ;;  %3526 = vmatprep.subr.bf16.mxu0 %v4925_v39 }
 0x27d   :  { %3577 = vmatprep.subr.bf16.mxu1 %v4347_v41 }
 0x27e   :  { %v2213_v24 = vpop.f32.mrf.mxu0 }
 0x27f   :  { %v2254_v25 = vpop.f32.mrf.mxu1  ;;  %v2214_v26 = vadd.f32 %v2213_v24, %v4945_v62 }
 0x280   :  { %v2215_v27 = vpop.f32.mrf.mxu0 }
 0x281   :  { %v2256_v28 = vpop.f32.mrf.mxu1  ;;  %v2255_v30 = vadd.f32 %v2254_v25, %v2214_v26  ;;  %v2216_v31 = vadd.f32 %v2215_v27, %v4955_v61 }
 0x282   :  { %v2217_v29 = vpop.f32.mrf.mxu0 }
 0x283   :  { %v2258_v34 = vpop.f32.mrf.mxu1  ;;  %v2257_v35 = vadd.f32 %v2256_v28, %v2216_v31 }
 0x284   :  { %v2218_v36 = vpop.f32.mrf.mxu0  ;;  %v3410_v34 = vld [vmem:[%s5085_s5] ss:$0 sm:$0xff]  ;;  %s4349_s5 = smov [#allocation12]  }
 0x285   :  { %v2259_v37 = vpop.f32.mrf.mxu1  ;;  %v2429_v38 = vcombine.low %v2255_v30, %v2257_v35  ;;  %s3140_s28 = sshll.u32 %s4349_s5, 4  ;;  %s3141_s28 = int_to_ptr.vmem [resolvable:$true] %s3140_s28 }
 0x286   :  { %s4309_s29 = scalar_lea.vmem %s3141_s28, 32  ;;  %p4314_p12 = scmp.lt.s32.totalorder %s3141_s28, %s3141_s28 }
 0x287   :  { %v2437_v22 = vrot.slane %v2429_v38, %v4416_v49  ;;  %p4310_p11 = scmp.ne.s32.totalorder %s3141_s28, %s4309_s29  ;;  %p4315_p13 = scmp.lt.s32.totalorder %s4309_s29, %s4309_s29 }
 0x289   :  { %p4316_p0 = por %p4315_p13, %p4314_p12 }
 0x28b   :  { %p4317_p1 = pnand %p4316_p0, %p4310_p11 }
 0x2be   :  { %v2295_v17 = vpop.f32.mrf.mxu0 }
 0x2bf   :  { %v2336_v62 = vpop.f32.mrf.mxu1 }
 0x2c0   :  { %v2337_v32 = vadd.f32 %v2336_v62, %v2295_v17  ;;  %v2297_v5 = vpop.f32.mrf.mxu0 }
 0x2c1   :  { %v2338_v1 = vpop.f32.mrf.mxu1 }
 0x2c2   :  { %v2299_v2 = vpop.f32.mrf.mxu0  ;;  %v2339_v63 = vadd.f32 %v2338_v1, %v2297_v5 }
 0x2c3   :  { %v2340_v61 = vpop.f32.mrf.mxu1 }
 0x2c4   :  { %v2300_v60 = vpop.f32.mrf.mxu0 }
 0x2c5   :  { %v2341_v0 = vpop.f32.mrf.mxu1 }
 0x2fe   :  { %v2377_v57 = vpop.f32.mrf.mxu0 }
 0x2ff   :  { %v2418_v52 = vpop.f32.mrf.mxu1  ;;  %v2378_v8 = vadd.f32 %v2377_v57, %v2337_v32 }
 0x300   :  { %v2379_v54 = vpop.f32.mrf.mxu0 }
 0x301   :  { %v2420_v56 = vpop.f32.mrf.mxu1  ;;  %v2380_v39 = vadd.f32 %v2379_v54, %v2339_v63  ;;  %v2419_v7 = vadd.f32 %v2418_v52, %v2378_v8 }
 0x302   :  { %v2381_v53 = vpop.f32.mrf.mxu0 }
 0x303   :  { %v2422_v3 = vpop.f32.mrf.mxu1  ;;  %v2421_v11 = vadd.f32 %v2420_v56, %v2380_v39 }
 0x304   :  { %v2382_v14 = vpop.f32.mrf.mxu0 }
 0x305   :  { %v2423_v18 = vpop.f32.mrf.mxu1  ;;  %v2430_v20 = vcombine.low %v2419_v7, %v2421_v11 }
 0x307   :  { %v2444_v23 = vrot.slane %v2430_v20, %v4416_v49 }
 0x309   :  { %v2445_v24 = vcombine.low %v2437_v22, %v2444_v23 }
 0x30b   :  { %v2976_v25 = vadd.f32 %v4898_v13, %v2445_v24 }
 0x30d   :  { %v2985_v26 = vrot.slane %v2976_v25, %v4416_v49  ;;  %v2978_v29 = vcombine.high %v2976_v25, %v2976_v25 }
 0x30f   :  { %v2993_v27 = vcombine.high %v2985_v26, %v2985_v26  ;;  %v2999_v30 = vpack.c.bf16 %v2985_v26, %v2985_v26 }
 0x311   :  { %v3000_v28 = vpack.c.bf16 %v2993_v27, %v2993_v27 }
 0x313   :  { %3035 = vmatprep.mubr.bf16.mxu1 %v3000_v28 }
 0x314   :  { %3036 = vmatmul.mubr.bf16.vlgmr.msra.gmra.mxu1 %v2999_v30 }
 0x315   :  { %3578 = vmatpush3.bf16.msra.mxu1 %v4031_v40  ;;  %3593 = vmatprep.mubr.msk.bf16.mxu1 %vm4348_vm0, %v4347_v41  ;;  %v2992_v40 = vrot.slane %v2978_v29, %v4416_v49 }
 0x316   :  { %3579 = vmatprep.subr.bf16.mxu1 %v4347_v41 }
 0x317   :  { %v2994_v1 = vcombine.high %v2992_v40, %v2992_v40  ;;  %v3001_v49 = vpack.c.bf16 %v2992_v40, %v2992_v40 }
 0x319   :  { %3580 = vmatpush3.bf16.msra.mxu1 %v4032_v42 }
 0x31a   :  { %3581 = vmatprep.subr.bf16.mxu1 %v4347_v41 }
 0x31d   :  { %3582 = vmatpush3.bf16.msra.mxu1 %v4033_v44 }
 0x31e   :  { %v3467_v31 = vpop.f32.mrf.mxu0  ;;  %3583 = vmatprep.subr.bf16.mxu1 %v4347_v41 }
 0x31f   :  { %v3489_v13 = vpop.f32.mrf.mxu1 }
 0x320   :  { %v3468_v35 = vpop.f32.mrf.mxu0 }
 0x321   :  { %v3469_v36 = vadd.f32 %v3468_v35, %v3467_v31  ;;  %v3490_v37 = vpop.f32.mrf.mxu1  ;;  %3584 = vmatpush3.bf16.msra.mxu1 %v5014_v45  ;;  %v3002_v45 = vpack.c.bf16 %v2994_v1, %v2994_v1 }
 0x322   :  { %v3470_v38 = vpop.f32.mrf.mxu0  ;;  %3585 = vmatprep.subr.bf16.mxu1 %v4347_v41  ;;  %v3491_v44 = vadd.f32 %v3490_v37, %v3489_v13 }
 0x323   :  { %v2830_v42 = vadd.f32 %v3469_v36, %v3410_v34  ;;  %v3492_v17 = vpop.f32.mrf.mxu1 }
 0x324   :  { %v3471_v62 = vpop.f32.mrf.mxu0 }
 0x325   :  { %v2870_v32 = vadd.f32 %v3491_v44, %v2830_v42  ;;  %v3493_v5 = vpop.f32.mrf.mxu1  ;;  %3586 = vmatpush3.bf16.msra.mxu1 %v5017_v47 }
 0x326   :  { %3587 = vmatprep.subr.bf16.mxu1 %v4347_v41 }
 0x327   :  { %v2875_v2 = vmax.f32 %v2870_v32, 0.0 }
 0x329   :  { %v2876_v61 = vpack.c.bf16 %v2875_v2, %v2875_v2  ;;  %3588 = vmatpush3.bf16.msra.mxu1 %v5022_v48 }
 0x32a   :  { %3589 = vmatprep.subr.bf16.mxu1 %v4347_v41 }
 0x32b   :  { %3574 = vmatmul.mubr.bf16.vlgmr.msra.gmra.mxu0 %v2876_v61 }
 0x32c   :  { %3527 = vmatpush3.bf16.msra.mxu0 %v4937_v46  ;;  %3075 = vmatprep.mubr.bf16.mxu0 %v3002_v45 }
 0x32d   :  { %3528 = vmatprep.subr.bf16.mxu0 %v4941_v50  ;;  %3590 = vmatpush3.bf16.msra.mxu1 %v5026_v51 }
 0x32e   :  { %3591 = vmatprep.subr.bf16.mxu1 %v4347_v41 }
 0x330   :  { %3529 = vmatpush3.bf16.msra.mxu0 %v4951_v59 }
 0x331   :  { %3530 = vmatprep.subr.bf16.mxu0 %v4959_v4  ;;  %3592 = vmatpush3.bf16.msra.mxu1 %v5030_v16 }
 0x334   :  { %3531 = vmatpush3.bf16.msra.mxu0 %v4964_v58 }
 0x335   :  { %3532 = vmatprep.subr.bf16.mxu0 %v4967_v6 }
 0x338   :  { %3533 = vmatpush3.bf16.msra.mxu0 %v4970_v33 }
 0x339   :  { %3534 = vmatprep.subr.bf16.mxu0 %v4973_v43 }
 0x33c   :  { %3535 = vmatpush3.bf16.msra.mxu0 %v4976_v9 }
 0x33d   :  { %3536 = vmatprep.subr.bf16.mxu0 %v4979_v55 }
 0x340   :  { %3537 = vmatpush3.bf16.msra.mxu0 %v4982_v10 }
 0x341   :  { %3538 = vmatprep.subr.bf16.mxu0 %v4985_v12 }
 0x344   :  { %3539 = vmatpush3.bf16.msra.mxu0 %v4988_v15 }
 0x345   :  { %3540 = vmatprep.subr.bf16.mxu0 %v4991_v19 }
 0x348   :  { %3541 = vmatpush3.bf16.msra.mxu0 %v4994_v21 }
 0x34b   :  { %3076 = vmatmul.mubr.bf16.vlgmr.msra.gmra.mxu0 %v3001_v49 }
 0x3d4   :  { %v3520_v46 = vpop.f32.mrf.mxu1 }
 0x3d6   :  { %v3521_v50 = vpop.f32.mrf.mxu1 }
 0x3d7   :  { %v3522_v10 = vadd.f32 %v3521_v50, %v3520_v46 }
 0x3d8   :  { %v3523_v59 = vpop.f32.mrf.mxu1 }
 0x3d9   :  { %v3038_v19 = vadd.f32 %v3522_v10, %v3410_v34 }
 0x3da   :  { %v3524_v4 = vpop.f32.mrf.mxu1 }
 0x3eb   :  { %v2959_v58 = vpop.f32.mrf.mxu0 }
 0x3ec   :  { %v2965_v6 = vmul.f32 %v2959_v58, %v2959_v58 }
 0x3ed   :  { %v3575_v33 = vpop.f32.mrf.mxu0 }
 0x3ee   :  { %v2967_v43 = vsel %vm2966_vm1, %v2965_v6, 0.0 }
 0x3ef   :  { %2968 = vadd.xlane.f32.xlu0 %v2967_v43  ;;  %v2962_v9 = vpop.f32.mrf.mxu0 }
 0x3f1   :  { %v3576_v55 = vpop.f32.mrf.mxu0 }
 0x40b   :  { %v3542_v12 = vpop.f32.mrf.mxu0 }
 0x40d   :  { %v3543_v15 = vpop.f32.mrf.mxu0 }
 0x40e   :  { %v3544_v21 = vadd.f32 %v3543_v15, %v3542_v12 }
 0x40f   :  { %v3545_v41 = vpop.f32.mrf.mxu0 }
 0x410   :  { %v3078_v47 = vadd.f32 %v3544_v21, %v3038_v19 }
 0x411   :  { %v3546_v48 = vpop.f32.mrf.mxu0 }
 0x412   :  { %v3083_v51 = vmax.f32 %v3078_v47, 0.0 }
 0x414   :  { %v3084_v16 = vpack.c.bf16 %v3083_v51, %v3083_v51 }
 0x416   :  { %3594 = vmatmul.mubr.bf16.vlgmr.msra.gmra.mxu1 %v3084_v16 }
 0x478   :  { %v2969_v60 = vpop.xlane.xlu0 %2968 }
 0x479   :  { %v2970_v0 = vmax.f32 %v2969_v60, 1e-24 }
 0x47b   :  { %4039 = vrsqrt.f32 %v2970_v0 }
 0x488   :  { %v4040_v57 = vpop.eup %4039 }
 0x489   :  { %v2972_v52 = vmul.f32 %v4040_v57, %v2959_v58 }
 0x48b   :  { %v2973_v63 = vpack.c.bf16 %v2972_v52, %v2972_v52 }
 0x48d   :  { %2974 = vst [vmem:[#allocation12] sm:$0x1] %v2973_v63 }
 0x4d6   :  { %v3119_v8 = vpop.f32.mrf.mxu1 }
 0x4d7   :  { %v3125_v54 = vmul.f32 %v3119_v8, %v3119_v8 }
 0x4d8   :  { %v3595_v56 = vpop.f32.mrf.mxu1 }
 0x4d9   :  { %v3126_v39 = vsel %vm2966_vm1, %v3125_v54, 0.0 }
 0x4da   :  { %3127 = vadd.xlane.f32.xlu0 %v3126_v39  ;;  %v3122_v53 = vpop.f32.mrf.mxu1 }
 0x4dc   :  { %v3596_v3 = vpop.f32.mrf.mxu1 }
 0x563   :  { %v3128_v7 = vpop.xlane.xlu0 %3127 }
 0x564   :  { %v3129_v11 = vmax.f32 %v3128_v7, 1e-24 }
 0x566   :  { %4041 = vrsqrt.f32 %v3129_v11 }
 0x573   :  { %v4042_v14 = vpop.eup %4041 }
 0x574   :  { %v3131_v18 = vmul.f32 %v4042_v14, %v3119_v8 }
 0x576   :  { %v3132_v20 = vpack.c.bf16 %v3131_v18, %v3131_v18 }
 0x578   :  { %3134 = vst [vmem:[#allocation12 + $0x1] sm:$0x1] %v3132_v20 }
 0x579   :  { %4320 = shalt.err (!%p4317_p1)
}
 0x57a   :  { %s4350_s30 = smov 1  }
 0x57b   :  { %3146 = dma.vmem_to_hbm [thread:$0]  %s3141_s28, 32, %s5087_s7, [#allocation5], %s4344_s20, %s4344_s20, %s4350_s30  }
 0x57c   :  { %4335 = dma.done.wait [#allocation5], 32  }
 0x57d   :  { %4336 = vsyncadd [#allocation5], 4294967264 }
 0x57e   :  { %3150 = vsyncpa [#allocation4], 1 }
 0x57f   :  { %3151 = vsyncpa [#allocation7], 1 }
 0x580   :  { %3152 = vsyncpa [#allocation10], 1 }
 0x581   :  { %3153 = vsyncpa [#allocation5], 1 }

</bundles_post_ra>
